<compile_context>
chip_gen: v7x
topology: tpu7x:2x2x1
jax: 0.10.0
libtpu: 0.0.40
codegen_flags: <defaults>
</compile_context>

<pallas_src>
import functools
import math

import jax
import jax.numpy as jnp
from jax.experimental import pallas as pl
from jax.experimental.pallas import tpu as pltpu


def _mlp_kernel(x_ref, w1_ref, b1_ref, w2_ref, b2_ref, w3_ref, b3_ref,
                w4_ref, b4_ref, o_ref):
    """All four linear layers + ReLU fused; one invocation per batch tile."""
    x = x_ref[...]                      # (tile_b, d_in) f32, d_in tiny (=2)
    w1 = w1_ref[...]                    # (d_in, H) f32
    d_in = x.shape[1]

    # Layer 1 on the VPU: rank-d_in outer-product update instead of a K=2
    # MXU matmul, so x never gets padded to 128 lanes.
    h = x[:, 0:1] * w1[0:1, :]
    for j in range(1, d_in):            # static, tiny loop (d_in == 2)
        h = h + x[:, j:j + 1] * w1[j:j + 1, :]
    h = h + b1_ref[...]
    h = jnp.maximum(h, 0.0).astype(jnp.bfloat16)

    # Hidden layers on the MXU in bf16, accumulating in f32.
    h = jnp.dot(h, w2_ref[...], preferred_element_type=jnp.float32) + b2_ref[...]
    h = jnp.maximum(h, 0.0).astype(jnp.bfloat16)

    h = jnp.dot(h, w3_ref[...], preferred_element_type=jnp.float32) + b3_ref[...]
    h = jnp.maximum(h, 0.0).astype(jnp.bfloat16)

    out = jnp.dot(h, w4_ref[...], preferred_element_type=jnp.float32) + b4_ref[...]
    # w4/b4 are lane-padded to 128 columns inside VMEM; keep only the real one(s).
    o_ref[...] = out[:, : o_ref.shape[1]].astype(o_ref.dtype)


def mlp_forward(x, params, *, tile_b=256):
    """Fused MLP forward.

    x:       (B, input_size) float32
    params:  dict with w1..w4 in (in, out) layout and b1..b4 of shape (1, out)
    returns: (B, 1) float32
    """
    B, d_in = x.shape
    w1 = params["w1"].astype(jnp.float32)   # tiny (d_in, H), stays f32
    b1 = params["b1"].astype(jnp.float32)
    w2 = params["w2"].astype(jnp.bfloat16)
    b2 = params["b2"].astype(jnp.float32)
    w3 = params["w3"].astype(jnp.bfloat16)
    b3 = params["b3"].astype(jnp.float32)
    H = w1.shape[1]
    d_out = params["w4"].shape[1]

    # Lane-pad only the tiny last layer so its matmul is 128-lane aligned.
    d_out_pad = pl.cdiv(d_out, 128) * 128
    w4 = jnp.pad(params["w4"], ((0, 0), (0, d_out_pad - d_out))).astype(jnp.bfloat16)
    b4 = jnp.pad(params["b4"], ((0, 0), (0, d_out_pad - d_out))).astype(jnp.float32)

    # Batch tiling: tile_b a multiple of 8 sublanes; pad ragged batches up.
    tile_b = max(8, min(tile_b, pl.cdiv(B, 8) * 8))
    B_pad = pl.cdiv(B, tile_b) * tile_b
    x_p = jnp.pad(x, ((0, B_pad - B), (0, 0))) if B_pad != B else x
    grid = (B_pad // tile_b,)

    def const_spec(shape):
        # Constant index_map across the grid -> the block is fetched once and
        # reused by every grid step.
        return pl.BlockSpec(shape, lambda i: (0, 0))

    flops = 2 * B_pad * (d_in * H + 2 * H * H + H * d_out_pad)
    bytes_accessed = (x_p.size * 4 + w1.size * 4 + w2.size * 2 + w3.size * 2
                      + w4.size * 2
                      + (b1.size + b2.size + b3.size + b4.size) * 4
                      + B_pad * d_out * 4)

    out = pl.pallas_call(
        _mlp_kernel,
        out_shape=jax.ShapeDtypeStruct((B_pad, d_out), jnp.float32),
        grid_spec=pltpu.PrefetchScalarGridSpec(
            num_scalar_prefetch=0,
            grid=grid,
            in_specs=[
                pl.BlockSpec((tile_b, d_in), lambda i: (i, 0)),       # x tile
                const_spec((d_in, H)),      const_spec((1, H)),       # layer 1
                const_spec((H, H)),         const_spec((1, H)),       # layer 2
                const_spec((H, H)),         const_spec((1, H)),       # layer 3
                const_spec((H, d_out_pad)), const_spec((1, d_out_pad)),  # layer 4
            ],
            out_specs=pl.BlockSpec((tile_b, d_out), lambda i: (i, 0)),
        ),
        compiler_params=pltpu.CompilerParams(
            dimension_semantics=("parallel",),
            vmem_limit_bytes=32 * 1024 * 1024,
        ),
        cost_estimate=pl.CostEstimate(flops=flops, transcendentals=0,
                                      bytes_accessed=bytes_accessed),
    )(x_p, w1, b1, w2, b2, w3, b3, w4, b4)

    return out[:B]


def init_params(key, input_size, n_hidden):
    """PyTorch-style (Kaiming-uniform-ish) Linear init, (in, out) layout."""
    dims = [(input_size, n_hidden), (n_hidden, n_hidden),
            (n_hidden, n_hidden), (n_hidden, 1)]
    params = {}
    keys = jax.random.split(key, 2 * len(dims))
    for idx, (fan_in, fan_out) in enumerate(dims):
        bound = 1.0 / math.sqrt(fan_in)
        w = jax.random.uniform(keys[2 * idx], (fan_in, fan_out),
                               minval=-bound, maxval=bound, dtype=jnp.float32)
        b = jax.random.uniform(keys[2 * idx + 1], (1, fan_out),
                               minval=-bound, maxval=bound, dtype=jnp.float32)
        params[f"w{idx + 1}"] = w
        params[f"b{idx + 1}"] = b
    return params


def mlp_reference(x, params):
    h = jnp.maximum(x @ params["w1"] + params["b1"], 0.0)
    h = jnp.maximum(h @ params["w2"] + params["b2"], 0.0)
    h = jnp.maximum(h @ params["w3"] + params["b3"], 0.0)
    return h @ params["w4"] + params["b4"]


if __name__ == "__main__":
    input_size = 2
    n_hidden = 256      # small stand-in for the module default 1024
    batch = 500         # deliberately ragged: pads to 512 -> grid of 2 tiles

    key = jax.random.PRNGKey(0)
    k_params, k_x = jax.random.split(key)
    params = init_params(k_params, input_size, n_hidden)
    x = jax.random.normal(k_x, (batch, input_size), dtype=jnp.float32)

    fwd = jax.jit(functools.partial(mlp_forward, tile_b=256))
    out = jax.block_until_ready(fwd(x, params))

    ref = mlp_reference(x, params)
    assert out.shape == (batch, 1), out.shape
    max_err = float(jnp.max(jnp.abs(out - ref)))
    # bf16 matmuls with f32 accumulation vs. the f32 reference.
    assert jnp.allclose(out, ref, atol=5e-2, rtol=5e-2), f"max|diff|={max_err}"

    print("KERNEL_OK")
</pallas_src>

<mosaic_0001>
module attributes {stable_mosaic.version = 11 : i64} {
  func.func @_mlp_kernel(%arg0: i32, %arg1: memref<256x2xf32, #tpu.memory_space<vmem>>, %arg2: memref<2x256xf32, #tpu.memory_space<vmem>>, %arg3: memref<1x256xf32, #tpu.memory_space<vmem>>, %arg4: memref<256x256xbf16, #tpu.memory_space<vmem>>, %arg5: memref<1x256xf32, #tpu.memory_space<vmem>>, %arg6: memref<256x256xbf16, #tpu.memory_space<vmem>>, %arg7: memref<1x256xf32, #tpu.memory_space<vmem>>, %arg8: memref<256x128xbf16, #tpu.memory_space<vmem>>, %arg9: memref<1x128xf32, #tpu.memory_space<vmem>>, %arg10: memref<256x1xf32, #tpu.memory_space<vmem>>) attributes {dimension_semantics = [#tpu.dimension_semantics<parallel>], iteration_bounds = array<i64: 2>, scalar_prefetch = 0 : i64, scratch_operands = 0 : i64, tpu.core_type = #tpu.core_type<tc>, window_params = [{transform_indices = @transform_0, window_bounds = array<i64: 256, 2>}, {pipeline_mode = #tpu.pipeline_mode<synchronous>, transform_indices = @transform_1, window_bounds = array<i64: 2, 256>}, {pipeline_mode = #tpu.pipeline_mode<synchronous>, transform_indices = @transform_2, window_bounds = array<i64: 1, 256>}, {pipeline_mode = #tpu.pipeline_mode<synchronous>, transform_indices = @transform_3, window_bounds = array<i64: 256, 256>}, {pipeline_mode = #tpu.pipeline_mode<synchronous>, transform_indices = @transform_4, window_bounds = array<i64: 1, 256>}, {pipeline_mode = #tpu.pipeline_mode<synchronous>, transform_indices = @transform_5, window_bounds = array<i64: 256, 256>}, {pipeline_mode = #tpu.pipeline_mode<synchronous>, transform_indices = @transform_6, window_bounds = array<i64: 1, 256>}, {pipeline_mode = #tpu.pipeline_mode<synchronous>, transform_indices = @transform_7, window_bounds = array<i64: 256, 128>}, {pipeline_mode = #tpu.pipeline_mode<synchronous>, transform_indices = @transform_8, window_bounds = array<i64: 1, 128>}, {transform_indices = @transform_9, window_bounds = array<i64: 256, 1>}]} {
    %c0 = arith.constant 0 : index
    %c0_0 = arith.constant 0 : index
    %0 = vector.load %arg1[%c0, %c0_0] : memref<256x2xf32, #tpu.memory_space<vmem>>, vector<256x2xf32>
    %c0_1 = arith.constant 0 : index
    %c0_2 = arith.constant 0 : index
    %1 = vector.load %arg2[%c0_1, %c0_2] : memref<2x256xf32, #tpu.memory_space<vmem>>, vector<2x256xf32>
    %2 = vector.extract_strided_slice %0 {offsets = [0, 0], sizes = [256, 1], strides = [1, 1]} : vector<256x2xf32> to vector<256x1xf32>
    %3 = vector.extract_strided_slice %1 {offsets = [0, 0], sizes = [1, 256], strides = [1, 1]} : vector<2x256xf32> to vector<1x256xf32>
    %4 = vector.broadcast %2 : vector<256x1xf32> to vector<256x256xf32>
    %5 = vector.broadcast %3 : vector<1x256xf32> to vector<256x256xf32>
    %6 = arith.mulf %4, %5 : vector<256x256xf32>
    %7 = vector.extract_strided_slice %0 {offsets = [0, 1], sizes = [256, 1], strides = [1, 1]} : vector<256x2xf32> to vector<256x1xf32>
    %8 = vector.extract_strided_slice %1 {offsets = [1, 0], sizes = [1, 256], strides = [1, 1]} : vector<2x256xf32> to vector<1x256xf32>
    %9 = vector.broadcast %7 : vector<256x1xf32> to vector<256x256xf32>
    %10 = vector.broadcast %8 : vector<1x256xf32> to vector<256x256xf32>
    %11 = arith.mulf %9, %10 : vector<256x256xf32>
    %12 = arith.addf %6, %11 : vector<256x256xf32>
    %c0_3 = arith.constant 0 : index
    %c0_4 = arith.constant 0 : index
    %13 = vector.load %arg3[%c0_3, %c0_4] : memref<1x256xf32, #tpu.memory_space<vmem>>, vector<1x256xf32>
    %14 = vector.broadcast %13 : vector<1x256xf32> to vector<256x256xf32>
    %15 = arith.addf %12, %14 : vector<256x256xf32>
    %cst = arith.constant 0.000000e+00 : f32
    %16 = vector.broadcast %cst : f32 to vector<256x256xf32>
    %17 = arith.maximumf %15, %16 : vector<256x256xf32>
    %18 = arith.truncf %17 : vector<256x256xf32> to vector<256x256xbf16>
    %c0_5 = arith.constant 0 : index
    %c0_6 = arith.constant 0 : index
    %19 = vector.load %arg4[%c0_5, %c0_6] : memref<256x256xbf16, #tpu.memory_space<vmem>>, vector<256x256xbf16>
    %cst_7 = arith.constant dense<0.000000e+00> : vector<256x256xf32>
    %20 = tpu.matmul %18, %19, %cst_7 {dimension_numbers = #tpu.dot_dimension_numbers<[1], [0], [0], [1], [0, 0, 1, 1], [], []>} : vector<256x256xbf16>, vector<256x256xbf16>, vector<256x256xf32> -> vector<256x256xf32>
    %c0_8 = arith.constant 0 : index
    %c0_9 = arith.constant 0 : index
    %21 = vector.load %arg5[%c0_8, %c0_9] : memref<1x256xf32, #tpu.memory_space<vmem>>, vector<1x256xf32>
    %22 = vector.broadcast %21 : vector<1x256xf32> to vector<256x256xf32>
    %23 = arith.addf %20, %22 : vector<256x256xf32>
    %cst_10 = arith.constant 0.000000e+00 : f32
    %24 = vector.broadcast %cst_10 : f32 to vector<256x256xf32>
    %25 = arith.maximumf %23, %24 : vector<256x256xf32>
    %26 = arith.truncf %25 : vector<256x256xf32> to vector<256x256xbf16>
    %c0_11 = arith.constant 0 : index
    %c0_12 = arith.constant 0 : index
    %27 = vector.load %arg6[%c0_11, %c0_12] : memref<256x256xbf16, #tpu.memory_space<vmem>>, vector<256x256xbf16>
    %cst_13 = arith.constant dense<0.000000e+00> : vector<256x256xf32>
    %28 = tpu.matmul %26, %27, %cst_13 {dimension_numbers = #tpu.dot_dimension_numbers<[1], [0], [0], [1], [0, 0, 1, 1], [], []>} : vector<256x256xbf16>, vector<256x256xbf16>, vector<256x256xf32> -> vector<256x256xf32>
    %c0_14 = arith.constant 0 : index
    %c0_15 = arith.constant 0 : index
    %29 = vector.load %arg7[%c0_14, %c0_15] : memref<1x256xf32, #tpu.memory_space<vmem>>, vector<1x256xf32>
    %30 = vector.broadcast %29 : vector<1x256xf32> to vector<256x256xf32>
    %31 = arith.addf %28, %30 : vector<256x256xf32>
    %cst_16 = arith.constant 0.000000e+00 : f32
    %32 = vector.broadcast %cst_16 : f32 to vector<256x256xf32>
    %33 = arith.maximumf %31, %32 : vector<256x256xf32>
    %34 = arith.truncf %33 : vector<256x256xf32> to vector<256x256xbf16>
    %c0_17 = arith.constant 0 : index
    %c0_18 = arith.constant 0 : index
    %35 = vector.load %arg8[%c0_17, %c0_18] : memref<256x128xbf16, #tpu.memory_space<vmem>>, vector<256x128xbf16>
    %cst_19 = arith.constant dense<0.000000e+00> : vector<256x128xf32>
    %36 = tpu.matmul %34, %35, %cst_19 {dimension_numbers = #tpu.dot_dimension_numbers<[1], [0], [0], [1], [0, 0, 1, 1], [], []>} : vector<256x256xbf16>, vector<256x128xbf16>, vector<256x128xf32> -> vector<256x128xf32>
    %c0_20 = arith.constant 0 : index
    %c0_21 = arith.constant 0 : index
    %37 = vector.load %arg9[%c0_20, %c0_21] : memref<1x128xf32, #tpu.memory_space<vmem>>, vector<1x128xf32>
    %38 = vector.broadcast %37 : vector<1x128xf32> to vector<256x128xf32>
    %39 = arith.addf %36, %38 : vector<256x128xf32>
    %40 = vector.extract_strided_slice %39 {offsets = [0, 0], sizes = [256, 1], strides = [1, 1]} : vector<256x128xf32> to vector<256x1xf32>
    %c0_22 = arith.constant 0 : index
    %c0_23 = arith.constant 0 : index
    %41 = vector.load %arg10[%c0_22, %c0_23] : memref<256x1xf32, #tpu.memory_space<vmem>>, vector<256x1xf32>
    tpu.vector_store %arg10[%c0_22, %c0_23], %40 {strides = array<i32>} : memref<256x1xf32, #tpu.memory_space<vmem>>, vector<256x1xf32>,
    return
  }
  func.func @transform_0(%arg0: i32) -> (i32, i32) {
    %c0_i32 = arith.constant 0 : i32
    %c0_i32_0 = arith.constant 0 : i32
    return %arg0, %c0_i32 : i32, i32
  }
  func.func @transform_1(%arg0: i32) -> (i32, i32) {
    %c0_i32 = arith.constant 0 : i32
    %c0_i32_0 = arith.constant 0 : i32
    %c0_i32_1 = arith.constant 0 : i32
    return %c0_i32, %c0_i32_0 : i32, i32
  }
  func.func @transform_2(%arg0: i32) -> (i32, i32) {
    %c0_i32 = arith.constant 0 : i32
    %c0_i32_0 = arith.constant 0 : i32
    %c0_i32_1 = arith.constant 0 : i32
    return %c0_i32, %c0_i32_0 : i32, i32
  }
  func.func @transform_3(%arg0: i32) -> (i32, i32) {
    %c0_i32 = arith.constant 0 : i32
    %c0_i32_0 = arith.constant 0 : i32
    %c0_i32_1 = arith.constant 0 : i32
    return %c0_i32, %c0_i32_0 : i32, i32
  }
  func.func @transform_4(%arg0: i32) -> (i32, i32) {
    %c0_i32 = arith.constant 0 : i32
    %c0_i32_0 = arith.constant 0 : i32
    %c0_i32_1 = arith.constant 0 : i32
    return %c0_i32, %c0_i32_0 : i32, i32
  }
  func.func @transform_5(%arg0: i32) -> (i32, i32) {
    %c0_i32 = arith.constant 0 : i32
    %c0_i32_0 = arith.constant 0 : i32
    %c0_i32_1 = arith.constant 0 : i32
    return %c0_i32, %c0_i32_0 : i32, i32
  }
  func.func @transform_6(%arg0: i32) -> (i32, i32) {
    %c0_i32 = arith.constant 0 : i32
    %c0_i32_0 = arith.constant 0 : i32
    %c0_i32_1 = arith.constant 0 : i32
    return %c0_i32, %c0_i32_0 : i32, i32
  }
  func.func @transform_7(%arg0: i32) -> (i32, i32) {
    %c0_i32 = arith.constant 0 : i32
    %c0_i32_0 = arith.constant 0 : i32
    %c0_i32_1 = arith.constant 0 : i32
    return %c0_i32, %c0_i32_0 : i32, i32
  }
  func.func @transform_8(%arg0: i32) -> (i32, i32) {
    %c0_i32 = arith.constant 0 : i32
    %c0_i32_0 = arith.constant 0 : i32
    %c0_i32_1 = arith.constant 0 : i32
    return %c0_i32, %c0_i32_0 : i32, i32
  }
  func.func @transform_9(%arg0: i32) -> (i32, i32) {
    %c0_i32 = arith.constant 0 : i32
    %c0_i32_0 = arith.constant 0 : i32
    return %arg0, %c0_i32 : i32, i32
  }
}

</mosaic_0001>

<bundles_post_ra>
// kernel: mlp_forward.1
= control target key start
LH: loop header
LB: loop body
LE: loop exit
PB: predicated region body
PF: predicated region fallthrough
CT: control target
= control target key end

     0   :  { %s2889_s30 = smov 0   ;;  %s3707_s0 = inlined_call_operand.vmem [shape: f32[512,2], index: 0, kind: input, shape index: {}]   ;;  %s3708_s1 = inlined_call_operand.vmem [shape: f32[2,256], index: 1, kind: input, shape index: {}]   ;;  %s3709_s2 = inlined_call_operand.vmem [shape: f32[1,256], index: 2, kind: input, shape index: {}]   ;;  %s3710_s3 = inlined_call_operand.vmem [shape: bf16[256,256], index: 3, kind: input, shape index: {}]   ;;  %s3711_s4 = inlined_call_operand.vmem [shape: f32[1,256], index: 4, kind: input, shape index: {}]   ;;  %s3712_s5 = inlined_call_operand.vmem [shape: bf16[256,256], index: 5, kind: input, shape index: {}]   ;;  %s3713_s6 = inlined_call_operand.vmem [shape: f32[1,256], index: 6, kind: input, shape index: {}]   ;;  %s3714_s7 = inlined_call_operand.vmem [shape: bf16[256,128], index: 7, kind: input, shape index: {}]   ;;  %s3715_s8 = inlined_call_operand.vmem [shape: f32[1,128], index: 8, kind: input, shape index: {}]   ;;  %s3716_s9 = inlined_call_operand.vmem [shape: f32[512,1], index: 9, kind: output, shape index: {}]  }
   0x1 LB: > { %s2430_s10 = sadd.s32 4294967295, %s2835_s30   ;;  %p2434_p0 = scmp.ge.s32.totalorder %s2835_s30, 1  ;;  %s2835_s30 = sphi %s2889_s30, %s19_s30  }
   0x2   : > { %p288_p1 = scmp.lt.s32.totalorder %s2835_s30, 3 }
   0x4   : > { %p289_p2 = pnand %p2434_p0, %p288_p1 }
   0x5   : > { %s2435_s11 = sshll.u32 (!%p289_p2), %s2430_s10, 5  ;;  %v2837_v0 = vmov (!%p289_p2), 1   ;;  %v2838_v1 = vmov (!%p289_p2), 0   ;;  %v2717_v2 = vld [vmem:[%s3710_s3 + $0x4] ss:$8 sps:$4 sm:$0xff] (!%p289_p2)   ;;  %v531_v60 = vlaneseq (!%p289_p2)  ;;  %vm2341_vm0 = vcmask (!%p289_p2), 7168  }
   0x6   : > { %292 = sbr.rel (%p289_p2) target bundleno = 1002 (0x3ea), region = 56  ;;  %2677 = vset.pattern.permute.xlu1 (!%p289_p2), %v2837_v0  ;;  %2676 = vset.pattern.permute.xlu0 (!%p289_p2), %v2838_v1  ;;  %p325_p3 = scmp.lt.s32.totalorder (!%p289_p2), %s2435_s11, 63  ;;  %v2719_v3 = vld [vmem:[%s3710_s3] ss:$8 sps:$4 sm:$0xff] (!%p289_p2)   ;;  %v2720_v4 = vld [vmem:[%s3710_s3 + $0x14] ss:$8 sps:$4 sm:$0xff] (!%p289_p2)  }
   0x7   : > { %1263 = vmatprep.subr.bf16.mxu0 (!%p289_p2), %v2717_v2  ;;  %2634 = vmatprep.subr.bf16.mxu1 (!%p289_p2), %v2717_v2  ;;  %v2722_v5 = vld [vmem:[%s3710_s3 + $0x10] ss:$8 sps:$4 sm:$0xff] (!%p289_p2)   ;;  %v2723_v6 = vld [vmem:[%s3710_s3 + $0x24] ss:$8 sps:$4 sm:$0xff] (!%p289_p2)   ;;  %v2725_v9 = vld [vmem:[%s3710_s3 + $0x20] ss:$8 sps:$4 sm:$0xff] (!%p289_p2)  }
   0x8   : > { %1264 = vmatpush1.bf16.msra.mxu0 (!%p289_p2), %v2719_v3  ;;  %2650 = vmatpush1.bf16.msra.mxu1 (!%p289_p2), %v2719_v3  ;;  %v2726_v10 = vld [vmem:[%s3710_s3 + $0x34] ss:$8 sps:$4 sm:$0xff] (!%p289_p2)   ;;  %v2728_v12 = vld [vmem:[%s3710_s3 + $0x30] ss:$8 sps:$4 sm:$0xff] (!%p289_p2)   ;;  %v2729_v13 = vld [vmem:[%s3710_s3 + $0x44] ss:$8 sps:$4 sm:$0xff] (!%p289_p2)  }
   0x9   : > { %1265 = vmatprep.subr.bf16.mxu0 (!%p289_p2), %v2720_v4  ;;  %2635 = vmatprep.subr.bf16.mxu1 (!%p289_p2), %v2720_v4  ;;  %v2731_v15 = vld [vmem:[%s3710_s3 + $0x40] ss:$8 sps:$4 sm:$0xff] (!%p289_p2)   ;;  %v2732_v16 = vld [vmem:[%s3710_s3 + $0x54] ss:$8 sps:$4 sm:$0xff] (!%p289_p2)   ;;  %v2734_v18 = vld [vmem:[%s3710_s3 + $0x50] ss:$8 sps:$4 sm:$0xff] (!%p289_p2)  }
   0xa   : > { %v2735_v19 = vld [vmem:[%s3710_s3 + $0x64] ss:$8 sps:$4 sm:$0xff] (!%p289_p2)   ;;  %v2737_v22 = vld [vmem:[%s3710_s3 + $0x60] ss:$8 sps:$4 sm:$0xff] (!%p289_p2)   ;;  %v2738_v23 = vld [vmem:[%s3710_s3 + $0x74] ss:$8 sps:$4 sm:$0xff] (!%p289_p2)  }
   0xb   : > { %v2740_v24 = vld [vmem:[%s3710_s3 + $0x70] ss:$8 sps:$4 sm:$0xff] (!%p289_p2)   ;;  %v2741_v25 = vld [vmem:[%s3710_s3 + $0x84] ss:$8 sps:$4 sm:$0xff] (!%p289_p2)   ;;  %v2743_v26 = vld [vmem:[%s3710_s3 + $0x80] ss:$8 sps:$4 sm:$0xff] (!%p289_p2)  }
   0xc   : > { %1266 = vmatpush1.bf16.msra.mxu0 (!%p289_p2), %v2722_v5  ;;  %2651 = vmatpush1.bf16.msra.mxu1 (!%p289_p2), %v2722_v5  ;;  %v2744_v28 = vld [vmem:[%s3710_s3 + $0x94] ss:$8 sps:$4 sm:$0xff] (!%p289_p2)   ;;  %v2746_v30 = vld [vmem:[%s3710_s3 + $0x90] ss:$8 sps:$4 sm:$0xff] (!%p289_p2)   ;;  %v2747_v32 = vld [vmem:[%s3710_s3 + $0xa4] ss:$8 sps:$4 sm:$0xff] (!%p289_p2)  }
   0xd   : > { %s3718_s11 = smov (!%p325_p3, %s2435_s11), 63  ;;  %1267 = vmatprep.subr.bf16.mxu0 %v2723_v6  ;;  %2636 = vmatprep.subr.bf16.mxu1 %v2723_v6  ;;  %v2749_v33 = vld [vmem:[%s3710_s3 + $0xa0] ss:$8 sps:$4 sm:$0xff]   ;;  %v2750_v34 = vld [vmem:[%s3710_s3 + $0xb4] ss:$8 sps:$4 sm:$0xff]   ;;  %v532_v62 = vshrl.u32 %v531_v60, 7 }
   0xe   : > { %s2436_s18 = sshll.u32 %s3718_s11, 3  ;;  %v2752_v37 = vld [vmem:[%s3710_s3 + $0xb0] ss:$8 sps:$4 sm:$0xff]   ;;  %v2753_v38 = vld [vmem:[%s3710_s3 + $0xc4] ss:$8 sps:$4 sm:$0xff]  }
   0xf   : > { %s2919_s23 = scalar_lea.vmem %s3707_s0, %s2436_s18  ;;  %v2755_v40 = vld [vmem:[%s3710_s3 + $0xc0] ss:$8 sps:$4 sm:$0xff]   ;;  %v2756_v41 = vld [vmem:[%s3710_s3 + $0xd4] ss:$8 sps:$4 sm:$0xff]   ;;  %v2758_v42 = vld [vmem:[%s3710_s3 + $0xd0] ss:$8 sps:$4 sm:$0xff]   ;;  %s3606_s29 = scalar_lea.vmem %s3716_s9, %s2436_s18 }
  0x10   : > { %v337_v7 = vld [vmem:[%s2919_s23] sm:$0xff]  ;;  %v338_v8 = vld [vmem:[%s2919_s23 + $0x8] sm:$0xff]  ;;  %v339_v11 = vld [vmem:[%s2919_s23 + $0x10] sm:$0xff]  ;;  %1268 = vmatpush1.bf16.msra.mxu0 %v2725_v9  ;;  %2652 = vmatpush1.bf16.msra.mxu1 %v2725_v9  ;;  %v3066_v63 = vsub.s32 1, %v532_v62  ;;  %v747_v2 = vsub.s32 3, %v532_v62  ;;  %v3068_v3 = vsub.s32 0, %v532_v62 }
  0x11   : > { %614 = vperm.xlu1 %2677, %v337_v7   ;;  %372 = vperm.xlu0 %2676, %v337_v7   ;;  %v340_v14 = vld [vmem:[%s2919_s23 + $0x18] sm:$0xff]  ;;  %v343_v17 = vld [vmem:[%s2919_s23 + $0x30] sm:$0xff]  ;;  %v341_v20 = vld [vmem:[%s2919_s23 + $0x20] sm:$0xff]  ;;  %v537_v4 = vsub.s32 2, %v532_v62 }
  0x12   : > { %1269 = vmatprep.subr.bf16.mxu0 %v2726_v10  ;;  %2637 = vmatprep.subr.bf16.mxu1 %v2726_v10  ;;  %v342_v21 = vld [vmem:[%s2919_s23 + $0x28] sm:$0xff]  ;;  %v344_v29 = vld [vmem:[%s2919_s23 + $0x38] sm:$0xff]  ;;  %v347_v31 = vld [vmem:[%s2919_s23 + $0x50] sm:$0xff] }
  0x13   : > { %v346_v27 = vld [vmem:[%s2919_s23 + $0x48] sm:$0xff]  ;;  %v345_v35 = vld [vmem:[%s2919_s23 + $0x40] sm:$0xff]  ;;  %v351_v36 = vld [vmem:[%s2919_s23 + $0x70] sm:$0xff] }
  0x14   : > { %1270 = vmatpush1.bf16.msra.mxu0 %v2728_v12  ;;  %2653 = vmatpush1.bf16.msra.mxu1 %v2728_v12  ;;  %v350_v39 = vld [vmem:[%s2919_s23 + $0x68] sm:$0xff]  ;;  %v348_v46 = vld [vmem:[%s2919_s23 + $0x58] sm:$0xff]  ;;  %v355_v48 = vld [vmem:[%s2919_s23 + $0x90] sm:$0xff] }
  0x15   : > { %618 = vperm.xlu1 %2677, %v338_v8   ;;  %377 = vperm.xlu0 %2676, %v338_v8   ;;  %v2759_v43 = vld [vmem:[%s3710_s3 + $0xe4] ss:$8 sps:$4 sm:$0xff]   ;;  %v2761_v45 = vld [vmem:[%s3710_s3 + $0xe0] ss:$8 sps:$4 sm:$0xff]   ;;  %v2762_v47 = vld [vmem:[%s3710_s3 + $0xf4] ss:$8 sps:$4 sm:$0xff]  }
  0x16   : > { %1271 = vmatprep.subr.bf16.mxu0 %v2729_v13  ;;  %2638 = vmatprep.subr.bf16.mxu1 %v2729_v13  ;;  %v354_v44 = vld [vmem:[%s2919_s23 + $0x88] sm:$0xff]  ;;  %v2764_v49 = vld [vmem:[%s3710_s3 + $0xf0] ss:$8 sps:$4 sm:$0xff]   ;;  %v349_v50 = vld [vmem:[%s2919_s23 + $0x60] sm:$0xff] }
  0x17   : > { %v359_v51 = vld [vmem:[%s2919_s23 + $0xb0] sm:$0xff]  ;;  %v358_v52 = vld [vmem:[%s2919_s23 + $0xa8] sm:$0xff]  ;;  %v352_v53 = vld [vmem:[%s2919_s23 + $0x78] sm:$0xff] }
  0x18   : > { %1272 = vmatpush1.bf16.msra.mxu0 %v2731_v15  ;;  %2654 = vmatpush1.bf16.msra.mxu1 %v2731_v15  ;;  %v3044_v54 = vld [vmem:[%s2919_s23 + $0xc8] sm:$0xff]  ;;  %v363_v55 = vld [vmem:[%s2919_s23 + $0xd0] sm:$0xff]  ;;  %v353_v56 = vld [vmem:[%s2919_s23 + $0x80] sm:$0xff] }
  0x19   : > { %2678 = vset.pattern.permute.xlu1 %v2838_v1  ;;  %382 = vperm.xlu0 %2676, %v339_v11   ;;  %v3055_v57 = vld [vmem:[%s2919_s23 + $0xe8] sm:$0xff]  ;;  %v367_v58 = vld [vmem:[%s2919_s23 + $0xf0] sm:$0xff]  ;;  %v356_v59 = vld [vmem:[%s2919_s23 + $0x98] sm:$0xff] }
  0x1a   : > { %387 = vperm.xlu1 %2678, %v340_v14   ;;  %1273 = vmatprep.subr.bf16.mxu0 %v2732_v16  ;;  %v357_v61 = vld [vmem:[%s2919_s23 + $0xa0] sm:$0xff] }
  0x1b   : > { %2639 = vmatprep.subr.bf16.mxu1 %v2732_v16  ;;  %v369_v5 = vld [vmem:[%s3708_s1] sm:$0xf] }
  0x1c   : > { %1274 = vmatpush1.bf16.msra.mxu0 %v2734_v18  ;;  %2655 = vmatpush1.bf16.msra.mxu1 %v2734_v18  ;;  %v744_v6 = vrot.slane %v369_v5, %v3066_v63  ;;  %v748_v7 = vrot.slane %v369_v5, %v747_v2  ;;  %v534_v8 = vrot.slane %v369_v5, %v3068_v3  ;;  %v887_v16 = vld [vmem:[%s3709_s2] sm:$0x3] }
  0x1d   : > { %2679 = vset.pattern.permute.xlu0 %v2837_v0  ;;  %1275 = vmatprep.subr.bf16.mxu0 %v2735_v19  ;;  %v538_v9 = vrot.slane %v369_v5, %v537_v4 }
  0x1e   : > { %2680 = vset.pattern.permute.xlu1 %v2837_v0  ;;  %622 = vperm.xlu0 %2679, %v339_v11   ;;  %v3077_v10 = vrot.slane %v744_v6, %v3066_v63  ;;  %v3080_v11 = vrot.slane %v748_v7, %v3066_v63  ;;  %v3083_v12 = vrot.slane %v534_v8, %v3068_v3 }
  0x1f   : > { %626 = vperm.xlu1 %2680, %v340_v14   ;;  %2640 = vmatprep.subr.bf16.mxu1 %v2735_v19  ;;  %v3086_v13 = vrot.slane %v538_v9, %v3068_v3  ;;  %v360_v14 = vld [vmem:[%s2919_s23 + $0xb8] sm:$0xff] }
  0x20   : > { %1276 = vmatpush1.bf16.msra.mxu0 %v2737_v22  ;;  %2656 = vmatpush1.bf16.msra.mxu1 %v2737_v22  ;;  %v3098_v22 = vrot.slane %v887_v16, %v3068_v3 }
  0x21   : > { %1277 = vmatprep.subr.bf16.mxu0 %v2738_v23  ;;  %2641 = vmatprep.subr.bf16.mxu1 %v2738_v23 }
  0x22   : > { %638 = vperm.xlu0 %2679, %v343_v17  }
  0x23   : > { %2681 = vset.pattern.permute.xlu1 %v2838_v1 }
  0x24   : > { %392 = vperm.xlu1 %2681, %v341_v20   ;;  %1278 = vmatpush1.bf16.msra.mxu0 %v2740_v24 }
  0x25   : > { %1279 = vmatprep.subr.bf16.mxu0 %v2741_v25  ;;  %2657 = vmatpush1.bf16.msra.mxu1 %v2740_v24 }
  0x26   : > { %2684 = vset.pattern.permute.xlu0 %v2838_v1  ;;  %2642 = vmatprep.subr.bf16.mxu1 %v2741_v25 }
  0x27   : > { %397 = vperm.xlu0 %2684, %v342_v21  }
  0x28   : > { %2682 = vset.pattern.permute.xlu1 %v2837_v0  ;;  %1280 = vmatpush1.bf16.msra.mxu0 %v2743_v26 }
  0x29   : > { %630 = vperm.xlu1 %2682, %v341_v20   ;;  %1281 = vmatprep.subr.bf16.mxu0 %v2744_v28 }
  0x2a   : > { %2658 = vmatpush1.bf16.msra.mxu1 %v2743_v26 }
  0x2b   : > { %402 = vperm.xlu0 %2684, %v343_v17   ;;  %2643 = vmatprep.subr.bf16.mxu1 %v2744_v28 }
  0x2c   : > { %1282 = vmatpush1.bf16.msra.mxu0 %v2746_v30 }
  0x2d   : > { %634 = vperm.xlu1 %2682, %v342_v21   ;;  %1283 = vmatprep.subr.bf16.mxu0 %v2747_v32 }
  0x2e   : > { %2659 = vmatpush1.bf16.msra.mxu1 %v2746_v30 }
  0x2f   : > { %417 = vperm.xlu0 %2684, %v346_v27   ;;  %2644 = vmatprep.subr.bf16.mxu1 %v2747_v32 }
  0x30   : > { %1284 = vmatpush1.bf16.msra.mxu0 %v2749_v33 }
  0x31   : > { %2683 = vset.pattern.permute.xlu1 %v2838_v1  ;;  %1285 = vmatprep.subr.bf16.mxu0 %v2750_v34 }
  0x32   : > { %407 = vperm.xlu1 %2683, %v344_v29   ;;  %2660 = vmatpush1.bf16.msra.mxu1 %v2749_v33 }
  0x33   : > { %422 = vperm.xlu0 %2684, %v347_v31   ;;  %2645 = vmatprep.subr.bf16.mxu1 %v2750_v34 }
  0x34   : > { %1286 = vmatpush1.bf16.msra.mxu0 %v2752_v37 }
  0x35   : > { %1287 = vmatprep.subr.bf16.mxu0 %v2753_v38 }
  0x36   : > { %2685 = vset.pattern.permute.xlu1 %v2837_v0  ;;  %2661 = vmatpush1.bf16.msra.mxu1 %v2752_v37 }
  0x37   : > { %642 = vperm.xlu1 %2685, %v344_v29   ;;  %2689 = vset.pattern.permute.xlu0 %v2837_v0 }
  0x38   : > { %654 = vperm.xlu0 %2689, %v347_v31   ;;  %2646 = vmatprep.subr.bf16.mxu1 %v2753_v38 }
  0x39   : > { %1288 = vmatpush1.bf16.msra.mxu0 %v2755_v40 }
  0x3a   : > { %2662 = vmatpush1.bf16.msra.mxu1 %v2755_v40  ;;  %1289 = vmatprep.subr.bf16.mxu0 %v2756_v41 }
  0x3b   : > { %2686 = vset.pattern.permute.xlu1 %v2838_v1  ;;  %2647 = vmatprep.subr.bf16.mxu1 %v2756_v41 }
  0x3c   : > { %412 = vperm.xlu1 %2686, %v345_v35   ;;  %670 = vperm.xlu0 %2689, %v351_v36  }
  0x3d   : > { %1290 = vmatpush1.bf16.msra.mxu0 %v2758_v42 }
  0x3e   : > { %2663 = vmatpush1.bf16.msra.mxu1 %v2758_v42  ;;  %1291 = vmatprep.subr.bf16.mxu0 %v2759_v43 }
  0x3f   : > { %2648 = vmatprep.subr.bf16.mxu1 %v2759_v43 }
  0x40   : > { %2687 = vset.pattern.permute.xlu1 %v2837_v0  ;;  %2694 = vset.pattern.permute.xlu0 %v2838_v1 }
  0x41   : > { %646 = vperm.xlu1 %2687, %v345_v35   ;;  %437 = vperm.xlu0 %2694, %v350_v39  }
  0x42   : > { %1292 = vmatpush1.bf16.msra.mxu0 %v2761_v45  ;;  %2664 = vmatpush1.bf16.msra.mxu1 %v2761_v45 }
  0x43   : > { %1293 = vmatprep.subr.bf16.mxu0 %v2762_v47  ;;  %2649 = vmatprep.subr.bf16.mxu1 %v2762_v47 }
  0x45   : > { %650 = vperm.xlu1 %2687, %v346_v27   ;;  %442 = vperm.xlu0 %2694, %v351_v36   ;;  %v3101_v27 = vrot.slane %v887_v16, %v3066_v63 }
  0x46   : > { %1294 = vmatpush1.bf16.msra.mxu0 %v2764_v49  ;;  %2665 = vmatpush1.bf16.msra.mxu1 %v2764_v49 }
  0x49   : > { %2688 = vset.pattern.permute.xlu1 %v2838_v1  ;;  %457 = vperm.xlu0 %2694, %v354_v44  }
  0x4a   : > { %427 = vperm.xlu1 %2688, %v348_v46  }
  0x4d   : > { %462 = vperm.xlu0 %2694, %v355_v48  }
  0x4e   : > { %2690 = vset.pattern.permute.xlu1 %v2837_v0 }
  0x4f   : > { %658 = vperm.xlu1 %2690, %v348_v46  }
  0x51   : > { %2699 = vset.pattern.permute.xlu0 %v2837_v0 }
  0x52   : > { %686 = vperm.xlu0 %2699, %v355_v48  }
  0x53   : > { %2691 = vset.pattern.permute.xlu1 %v2838_v1 }
  0x54   : > { %432 = vperm.xlu1 %2691, %v349_v50  }
  0x56   : > { %702 = vperm.xlu0 %2699, %v359_v51  }
  0x58   : > { %2692 = vset.pattern.permute.xlu1 %v2837_v0 }
  0x59   : > { %662 = vperm.xlu1 %2692, %v349_v50  }
  0x5a   : > { %2704 = vset.pattern.permute.xlu0 %v2838_v1 }
  0x5b   : > { %477 = vperm.xlu0 %2704, %v358_v52  }
  0x5d   : > { %666 = vperm.xlu1 %2692, %v350_v39   ;;  %v361_v39 = vld [vmem:[%s2919_s23 + $0xc0] sm:$0xff] }
  0x5f   : > { %482 = vperm.xlu0 %2704, %v359_v51  }
  0x61   : > { %2693 = vset.pattern.permute.xlu1 %v2838_v1 }
  0x62   : > { %447 = vperm.xlu1 %2693, %v352_v53  }
  0x63   : > { %497 = vperm.xlu0 %2704, %v3044_v54  }
  0x66   : > { %2695 = vset.pattern.permute.xlu1 %v2837_v0 }
  0x67   : > { %674 = vperm.xlu1 %2695, %v352_v53   ;;  %2709 = vset.pattern.permute.xlu0 %v2837_v0 }
  0x68   : > { %718 = vperm.xlu0 %2709, %v363_v55  }
  0x6b   : > { %2696 = vset.pattern.permute.xlu1 %v2838_v1 }
  0x6c   : > { %452 = vperm.xlu1 %2696, %v353_v56   ;;  %2710 = vset.pattern.permute.xlu0 %v2838_v1 }
  0x6d   : > { %502 = vperm.xlu0 %2710, %v363_v55  }
  0x70   : > { %2697 = vset.pattern.permute.xlu1 %v2837_v0 }
  0x71   : > { %678 = vperm.xlu1 %2697, %v353_v56   ;;  %517 = vperm.xlu0 %2710, %v3055_v57  }
  0x75   : > { %682 = vperm.xlu1 %2697, %v354_v44   ;;  %522 = vperm.xlu0 %2710, %v367_v58  }
  0x79   : > { %2698 = vset.pattern.permute.xlu1 %v2838_v1  ;;  %2715 = vset.pattern.permute.xlu0 %v2837_v0 }
  0x7a   : > { %467 = vperm.xlu1 %2698, %v356_v59   ;;  %734 = vperm.xlu0 %2715, %v367_v58  }
  0x7e   : > { %2700 = vset.pattern.permute.xlu1 %v2837_v0 }
  0x7f   : > { %690 = vperm.xlu1 %2700, %v356_v59  }
  0x83   : > { %2701 = vset.pattern.permute.xlu1 %v2838_v1 }
  0x84   : > { %472 = vperm.xlu1 %2701, %v357_v61  }
  0x88   : > { %2702 = vset.pattern.permute.xlu1 %v2837_v0 }
  0x89   : > { %694 = vperm.xlu1 %2702, %v357_v61  }
  0x8d   : > { %698 = vperm.xlu1 %2702, %v358_v52  }
  0x90   : > { %v615_v15 = vpop.permute.xlu1 %614  ;;  %v373_v17 = vpop.permute.xlu0 %372 }
  0x91   : > { %v759_v18 = vmul.f32 %v3077_v10, %v615_v15  ;;  %v760_v19 = vmul.f32 %v3080_v11, %v615_v15  ;;  %v549_v20 = vmul.f32 %v3083_v12, %v373_v17  ;;  %v550_v21 = vmul.f32 %v3086_v13, %v373_v17  ;;  %2703 = vset.pattern.permute.xlu1 %v2838_v1 }
  0x92   : > { %487 = vperm.xlu1 %2703, %v360_v14  }
  0x93   : > { %v823_v23 = vadd.f32 %v759_v18, %v549_v20  ;;  %v824_v24 = vadd.f32 %v760_v19, %v550_v21  ;;  %v364_v18 = vld [vmem:[%s2919_s23 + $0xd8] sm:$0xff] }
  0x94   : > { %v619_v25 = vpop.permute.xlu1 %618  ;;  %v378_v26 = vpop.permute.xlu0 %377 }
  0x95   : > { %v761_v28 = vmul.f32 %v3077_v10, %v619_v25  ;;  %v762_v29 = vmul.f32 %v3080_v11, %v619_v25  ;;  %v551_v30 = vmul.f32 %v3083_v12, %v378_v26  ;;  %v552_v31 = vmul.f32 %v3086_v13, %v378_v26 }
  0x96   : > { %2705 = vset.pattern.permute.xlu1 %v2837_v0  ;;  %v899_v32 = vadd.f32 %v3098_v22, %v823_v23  ;;  %v900_v36 = vadd.f32 %v3101_v27, %v824_v24 }
  0x97   : > { %v825_v33 = vadd.f32 %v761_v28, %v551_v30  ;;  %706 = vperm.xlu1 %2705, %v360_v14   ;;  %v826_v34 = vadd.f32 %v762_v29, %v552_v31 }
  0x98   : > { %v383_v35 = vpop.permute.xlu0 %382  ;;  %v963_v41 = vmax.f32 %v899_v32, 0.0  ;;  %v964_v45 = vmax.f32 %v900_v36, 0.0 }
  0x99   : > { %v901_v37 = vadd.f32 %v3098_v22, %v825_v33  ;;  %v388_v38 = vpop.permute.xlu1 %387  ;;  %v902_v40 = vadd.f32 %v3101_v27, %v826_v34  ;;  %v553_v43 = vmul.f32 %v3083_v12, %v383_v35  ;;  %v554_v44 = vmul.f32 %v3086_v13, %v383_v35 }
  0x9a   : > { %v555_v53 = vmul.f32 %v3083_v12, %v388_v38  ;;  %v556_v55 = vmul.f32 %v3086_v13, %v388_v38 }
  0x9b   : > { %2706 = vset.pattern.permute.xlu1 %v2838_v1  ;;  %v965_v42 = vmax.f32 %v901_v37, 0.0  ;;  %v966_v46 = vmax.f32 %v902_v40, 0.0 }
  0x9c   : > { %492 = vperm.xlu1 %2706, %v361_v39  }
  0x9d   : > { %v623_v47 = vpop.permute.xlu0 %622  ;;  %v1027_v48 = vpack.c.bf16 %v965_v42, %v963_v41  ;;  %v1028_v52 = vpack.c.bf16 %v966_v46, %v964_v45  ;;  %v365_v46 = vld [vmem:[%s2919_s23 + $0xe0] sm:$0xff] }
  0x9e   : > { %v627_v49 = vpop.permute.xlu1 %626  ;;  %v763_v50 = vmul.f32 %v3077_v10, %v623_v47  ;;  %v764_v51 = vmul.f32 %v3080_v11, %v623_v47 }
  0x9f   : > { %v765_v56 = vmul.f32 %v3077_v10, %v627_v49  ;;  %v766_v58 = vmul.f32 %v3080_v11, %v627_v49  ;;  %1295 = vmatprep.mubr.bf16.mxu0 %v1028_v52 }
  0xa0   : > { %v827_v59 = vadd.f32 %v763_v50, %v553_v43  ;;  %v828_v60 = vadd.f32 %v764_v51, %v554_v44  ;;  %2707 = vset.pattern.permute.xlu1 %v2837_v0  ;;  %1296 = vmatmul.mubr.bf16.vlgmr.msra.gmra.mrb[0].mxu0 %v1027_v48 }
  0xa1   : > { %v829_v61 = vadd.f32 %v765_v56, %v555_v53  ;;  %v830_v62 = vadd.f32 %v766_v58, %v556_v55  ;;  %710 = vperm.xlu1 %2707, %v361_v39   ;;  %v639_v2 = vpop.permute.xlu0 %638 }
  0xa2   : > { %v903_v4 = vadd.f32 %v3098_v22, %v827_v59  ;;  %v904_v5 = vadd.f32 %v3101_v27, %v828_v60  ;;  %v771_v35 = vmul.f32 %v3077_v10, %v639_v2  ;;  %v772_v36 = vmul.f32 %v3080_v11, %v639_v2 }
  0xa3   : > { %v905_v6 = vadd.f32 %v3098_v22, %v829_v61  ;;  %v906_v7 = vadd.f32 %v3101_v27, %v830_v62  ;;  %v393_v8 = vpop.permute.xlu1 %392 }
  0xa4   : > { %v968_v9 = vmax.f32 %v904_v5, 0.0  ;;  %v967_v14 = vmax.f32 %v903_v4, 0.0  ;;  %v557_v21 = vmul.f32 %v3083_v12, %v393_v8  ;;  %v558_v24 = vmul.f32 %v3086_v13, %v393_v8 }
  0xa5   : > { %714 = vperm.xlu1 %2707, %v3044_v54   ;;  %v970_v15 = vmax.f32 %v906_v7, 0.0  ;;  %v969_v16 = vmax.f32 %v905_v6, 0.0 }
  0xa6   : > { %v398_v20 = vpop.permute.xlu0 %397 }
  0xa7   : > { %v1030_v17 = vpack.c.bf16 %v970_v15, %v968_v9  ;;  %v1029_v19 = vpack.c.bf16 %v969_v16, %v967_v14  ;;  %v559_v29 = vmul.f32 %v3083_v12, %v398_v20  ;;  %v560_v30 = vmul.f32 %v3086_v13, %v398_v20 }
  0xa8   : > { %v631_v23 = vpop.permute.xlu1 %630 }
  0xa9   : > { %v767_v25 = vmul.f32 %v3077_v10, %v631_v23  ;;  %v768_v26 = vmul.f32 %v3080_v11, %v631_v23  ;;  %2708 = vset.pattern.permute.xlu1 %v2838_v1  ;;  %1305 = vmatprep.mubr.bf16.mxu0 %v1030_v17 }
  0xaa   : > { %507 = vperm.xlu1 %2708, %v364_v18   ;;  %1306 = vmatmul.mubr.bf16.gmra.mrb[4].mxu0 %v1029_v19  ;;  %v403_v31 = vpop.permute.xlu0 %402  ;;  %v2767_v19 = vld [vmem:[%s3712_s5 + $0x4] ss:$8 sps:$4 sm:$0xff]  }
  0xab   : > { %v831_v54 = vadd.f32 %v767_v25, %v557_v21  ;;  %v832_v28 = vadd.f32 %v768_v26, %v558_v24  ;;  %v561_v37 = vmul.f32 %v3083_v12, %v403_v31  ;;  %v562_v38 = vmul.f32 %v3086_v13, %v403_v31  ;;  %v368_v21 = vld [vmem:[%s2919_s23 + $0xf8] sm:$0xff]  ;;  %1756 = vmatprep.subr.bf16.mxu1 %v2767_v19 }
  0xac   : > { %v635_v32 = vpop.permute.xlu1 %634 }
  0xad   : > { %v769_v33 = vmul.f32 %v3077_v10, %v635_v32  ;;  %v770_v34 = vmul.f32 %v3080_v11, %v635_v32  ;;  %v907_v39 = vadd.f32 %v3098_v22, %v831_v54  ;;  %v908_v40 = vadd.f32 %v3101_v27, %v832_v28 }
  0xae   : > { %2711 = vset.pattern.permute.xlu1 %v2837_v0  ;;  %v835_v47 = vadd.f32 %v771_v35, %v561_v37  ;;  %v836_v48 = vadd.f32 %v772_v36, %v562_v38  ;;  %v418_v6 = vpop.permute.xlu0 %417 }
  0xaf   : > { %v833_v41 = vadd.f32 %v769_v33, %v559_v29  ;;  %v834_v42 = vadd.f32 %v770_v34, %v560_v30  ;;  %722 = vperm.xlu1 %2711, %v364_v18   ;;  %v972_v49 = vmax.f32 %v908_v40, 0.0  ;;  %v971_v51 = vmax.f32 %v907_v39, 0.0 }
  0xb0   : > { %v911_v58 = vadd.f32 %v3098_v22, %v835_v47  ;;  %v912_v59 = vadd.f32 %v3101_v27, %v836_v48  ;;  %v567_v30 = vmul.f32 %v3083_v12, %v418_v6  ;;  %v568_v31 = vmul.f32 %v3086_v13, %v418_v6 }
  0xb1   : > { %v909_v43 = vadd.f32 %v3098_v22, %v833_v41  ;;  %v910_v44 = vadd.f32 %v3101_v27, %v834_v42  ;;  %v408_v45 = vpop.permute.xlu1 %407 }
  0xb2   : > { %v563_v60 = vmul.f32 %v3083_v12, %v408_v45  ;;  %v564_v61 = vmul.f32 %v3086_v13, %v408_v45  ;;  %v976_v14 = vmax.f32 %v912_v59, 0.0  ;;  %v975_v15 = vmax.f32 %v911_v58, 0.0  ;;  %v423_v18 = vpop.permute.xlu0 %422 }
  0xb3   : > { %2712 = vset.pattern.permute.xlu1 %v2838_v1  ;;  %v974_v50 = vmax.f32 %v910_v44, 0.0  ;;  %v973_v52 = vmax.f32 %v909_v43, 0.0  ;;  %v569_v36 = vmul.f32 %v3083_v12, %v423_v18 }
  0xb4   : > { %512 = vperm.xlu1 %2712, %v365_v46  }
  0xb5   : > { %v1032_v53 = vpack.c.bf16 %v974_v50, %v972_v49  ;;  %v1031_v55 = vpack.c.bf16 %v973_v52, %v971_v51 }
  0xb6   : > { %v643_v56 = vpop.permute.xlu1 %642 }
  0xb7   : > { %v773_v62 = vmul.f32 %v3077_v10, %v643_v56  ;;  %v774_v2 = vmul.f32 %v3080_v11, %v643_v56  ;;  %1315 = vmatprep.mubr.bf16.mxu0 %v1032_v53  ;;  %v655_v32 = vpop.permute.xlu0 %654 }
  0xb8   : > { %2713 = vset.pattern.permute.xlu1 %v2837_v0  ;;  %1316 = vmatmul.mubr.bf16.gmra.mrb[8].mxu0 %v1031_v55  ;;  %v779_v37 = vmul.f32 %v3077_v10, %v655_v32  ;;  %v780_v38 = vmul.f32 %v3080_v11, %v655_v32 }
  0xb9   : > { %v837_v4 = vadd.f32 %v773_v62, %v563_v60  ;;  %v838_v5 = vadd.f32 %v774_v2, %v564_v61  ;;  %726 = vperm.xlu1 %2713, %v365_v46  }
  0xba   : > { %v843_v45 = vadd.f32 %v779_v37, %v569_v36 }
  0xbb   : > { %v913_v7 = vadd.f32 %v3098_v22, %v837_v4  ;;  %v914_v8 = vadd.f32 %v3101_v27, %v838_v5  ;;  %v413_v9 = vpop.permute.xlu1 %412  ;;  %v671_v4 = vpop.permute.xlu0 %670 }
  0xbc   : > { %v565_v24 = vmul.f32 %v3083_v12, %v413_v9  ;;  %v566_v26 = vmul.f32 %v3086_v13, %v413_v9  ;;  %v919_v55 = vadd.f32 %v3098_v22, %v843_v45  ;;  %v787_v32 = vmul.f32 %v3077_v10, %v671_v4 }
  0xbd   : > { %730 = vperm.xlu1 %2713, %v3055_v57   ;;  %v978_v16 = vmax.f32 %v914_v8, 0.0  ;;  %v977_v17 = vmax.f32 %v913_v7, 0.0 }
  0xbe   : > { %v983_v9 = vmax.f32 %v919_v55, 0.0 }
  0xbf   : > { %v1034_v20 = vpack.c.bf16 %v978_v16, %v976_v14  ;;  %v1033_v23 = vpack.c.bf16 %v977_v17, %v975_v15 }
  0xc0   : > { %v647_v25 = vpop.permute.xlu1 %646 }
  0xc1   : > { %v775_v54 = vmul.f32 %v3077_v10, %v647_v25  ;;  %v776_v57 = vmul.f32 %v3080_v11, %v647_v25  ;;  %2714 = vset.pattern.permute.xlu1 %v2838_v1  ;;  %1325 = vmatprep.mubr.bf16.mxu0 %v1034_v20  ;;  %v570_v1 = vmul.f32 %v3086_v13, %v423_v18  ;;  %v438_v18 = vpop.permute.xlu0 %437 }
  0xc2   : > { %527 = vperm.xlu1 %2714, %v368_v21   ;;  %1326 = vmatmul.mubr.bf16.gmra.mrb[12].mxu0 %v1033_v23 }
  0xc3   : > { %v839_v28 = vadd.f32 %v775_v54, %v565_v24  ;;  %v840_v29 = vadd.f32 %v776_v57, %v566_v26  ;;  %v844_v46 = vadd.f32 %v780_v38, %v570_v1  ;;  %v575_v54 = vmul.f32 %v3083_v12, %v438_v18 }
  0xc4   : > { %v651_v33 = vpop.permute.xlu1 %650  ;;  %v576_v57 = vmul.f32 %v3086_v13, %v438_v18 }
  0xc5   : > { %v777_v34 = vmul.f32 %v3077_v10, %v651_v33  ;;  %v778_v35 = vmul.f32 %v3080_v11, %v651_v33  ;;  %v915_v39 = vadd.f32 %v3098_v22, %v839_v28  ;;  %v916_v40 = vadd.f32 %v3101_v27, %v840_v29  ;;  %v443_v28 = vpop.permute.xlu0 %442 }
  0xc6   : > { %2716 = vset.pattern.permute.xlu1 %v2837_v0  ;;  %v920_v56 = vadd.f32 %v3101_v27, %v844_v46  ;;  %v788_v33 = vmul.f32 %v3080_v11, %v671_v4 }
  0xc7   : > { %v841_v41 = vadd.f32 %v777_v34, %v567_v30  ;;  %v842_v42 = vadd.f32 %v778_v35, %v568_v31  ;;  %738 = vperm.xlu1 %2716, %v368_v21   ;;  %v980_v47 = vmax.f32 %v916_v40, 0.0  ;;  %v979_v49 = vmax.f32 %v915_v39, 0.0 }
  0xc8   : > { %v984_v8 = vmax.f32 %v920_v56, 0.0  ;;  %v577_v34 = vmul.f32 %v3083_v12, %v443_v28  ;;  %v578_v35 = vmul.f32 %v3086_v13, %v443_v28 }
  0xc9   : > { %v917_v43 = vadd.f32 %v3098_v22, %v841_v41  ;;  %v918_v44 = vadd.f32 %v3101_v27, %v842_v42  ;;  %v428_v0 = vpop.permute.xlu1 %427 }
  0xca   : > { %v571_v58 = vmul.f32 %v3083_v12, %v428_v0  ;;  %v572_v59 = vmul.f32 %v3086_v13, %v428_v0  ;;  %v851_v42 = vadd.f32 %v787_v32, %v577_v34 }
  0xcb   : > { %v982_v48 = vmax.f32 %v918_v44, 0.0  ;;  %v981_v50 = vmax.f32 %v917_v43, 0.0  ;;  %v852_v43 = vadd.f32 %v788_v33, %v578_v35 }
  0xcd   : > { %v1036_v51 = vpack.c.bf16 %v982_v48, %v980_v47  ;;  %v1035_v52 = vpack.c.bf16 %v981_v50, %v979_v49  ;;  %v927_v50 = vadd.f32 %v3098_v22, %v851_v42 }
  0xce   : > { %v659_v53 = vpop.permute.xlu1 %658 }
  0xcf   : > { %v781_v60 = vmul.f32 %v3077_v10, %v659_v53  ;;  %v782_v61 = vmul.f32 %v3080_v11, %v659_v53  ;;  %1335 = vmatprep.mubr.bf16.mxu0 %v1036_v51  ;;  %v928_v51 = vadd.f32 %v3101_v27, %v852_v43 }
  0xd0   : > { %1336 = vmatmul.mubr.bf16.gmra.mrb[16].mxu0 %v1035_v52 }
  0xd1   : > { %v845_v62 = vadd.f32 %v781_v60, %v571_v58  ;;  %v846_v2 = vadd.f32 %v782_v61, %v572_v59  ;;  %v458_v60 = vpop.permute.xlu0 %457  ;;  %v992_v4 = vmax.f32 %v928_v51, 0.0 }
  0xd3   : > { %v921_v5 = vadd.f32 %v3098_v22, %v845_v62  ;;  %v922_v6 = vadd.f32 %v3101_v27, %v846_v2  ;;  %v433_v7 = vpop.permute.xlu1 %432 }
  0xd4   : > { %v573_v20 = vmul.f32 %v3083_v12, %v433_v7  ;;  %v574_v21 = vmul.f32 %v3086_v13, %v433_v7 }
  0xd5   : > { %v986_v14 = vmax.f32 %v922_v6, 0.0  ;;  %v985_v15 = vmax.f32 %v921_v5, 0.0  ;;  %v991_v5 = vmax.f32 %v927_v50, 0.0 }
  0xd7   : > { %v1038_v16 = vpack.c.bf16 %v986_v14, %v984_v8  ;;  %v1037_v17 = vpack.c.bf16 %v985_v15, %v983_v9  ;;  %v463_v8 = vpop.permute.xlu0 %462 }
  0xd8   : > { %v663_v19 = vpop.permute.xlu1 %662  ;;  %v585_v28 = vmul.f32 %v3083_v12, %v463_v8 }
  0xd9   : > { %v783_v23 = vmul.f32 %v3077_v10, %v663_v19  ;;  %v784_v24 = vmul.f32 %v3080_v11, %v663_v19  ;;  %1345 = vmatprep.mubr.bf16.mxu0 %v1038_v16 }
  0xda   : > { %1346 = vmatmul.mubr.bf16.gmra.mrb[20].mxu0 %v1037_v17 }
  0xdb   : > { %v847_v25 = vadd.f32 %v783_v23, %v573_v20  ;;  %v848_v26 = vadd.f32 %v784_v24, %v574_v21  ;;  %v583_v23 = vmul.f32 %v3083_v12, %v458_v60  ;;  %v584_v24 = vmul.f32 %v3086_v13, %v458_v60  ;;  %v2773_v60 = vld [vmem:[%s3712_s5 + $0x24] ss:$8 sps:$4 sm:$0xff]  }
  0xdc   : > { %v667_v29 = vpop.permute.xlu1 %666 }
  0xdd   : > { %v785_v30 = vmul.f32 %v3077_v10, %v667_v29  ;;  %v786_v31 = vmul.f32 %v3080_v11, %v667_v29  ;;  %v923_v36 = vadd.f32 %v3098_v22, %v847_v25  ;;  %v924_v1 = vadd.f32 %v3101_v27, %v848_v26  ;;  %v687_v25 = vpop.permute.xlu0 %686 }
  0xde   : > { %v586_v29 = vmul.f32 %v3086_v13, %v463_v8  ;;  %v2771_v8 = vld [vmem:[%s3712_s5 + $0x20] ss:$8 sps:$4 sm:$0xff]  }
  0xdf   : > { %v849_v37 = vadd.f32 %v785_v30, %v575_v54  ;;  %v850_v38 = vadd.f32 %v786_v31, %v576_v57  ;;  %v988_v44 = vmax.f32 %v924_v1, 0.0  ;;  %v987_v45 = vmax.f32 %v923_v36, 0.0 }
  0xe0   : > { %v795_v30 = vmul.f32 %v3077_v10, %v687_v25  ;;  %v796_v31 = vmul.f32 %v3080_v11, %v687_v25 }
  0xe1   : > { %v925_v39 = vadd.f32 %v3098_v22, %v849_v37  ;;  %v926_v40 = vadd.f32 %v3101_v27, %v850_v38  ;;  %v448_v41 = vpop.permute.xlu1 %447 }
  0xe2   : > { %v579_v52 = vmul.f32 %v3083_v12, %v448_v41  ;;  %v580_v53 = vmul.f32 %v3086_v13, %v448_v41  ;;  %v859_v38 = vadd.f32 %v795_v30, %v585_v28 }
  0xe3   : > { %v990_v0 = vmax.f32 %v926_v40, 0.0  ;;  %v989_v46 = vmax.f32 %v925_v39, 0.0  ;;  %v860_v39 = vadd.f32 %v796_v31, %v586_v29 }
  0xe5   : > { %v1040_v47 = vpack.c.bf16 %v990_v0, %v988_v44  ;;  %v1039_v48 = vpack.c.bf16 %v989_v46, %v987_v45  ;;  %v2765_v45 = vld [vmem:[%s3712_s5] ss:$8 sps:$4 sm:$0xff]  }
  0xe6   : > { %v675_v49 = vpop.permute.xlu1 %674 }
  0xe7   : > { %v789_v55 = vmul.f32 %v3077_v10, %v675_v49  ;;  %v790_v56 = vmul.f32 %v3080_v11, %v675_v49  ;;  %1355 = vmatprep.mubr.bf16.mxu0 %v1040_v47  ;;  %v935_v47 = vadd.f32 %v3098_v22, %v859_v38  ;;  %v2770_v49 = vld [vmem:[%s3712_s5 + $0x14] ss:$8 sps:$4 sm:$0xff]  }
  0xe8   : > { %1356 = vmatmul.mubr.bf16.gmra.mrb[24].mxu0 %v1039_v48  ;;  %v936_v48 = vadd.f32 %v3101_v27, %v860_v39 }
  0xe9   : > { %v853_v58 = vadd.f32 %v789_v55, %v579_v52  ;;  %v854_v59 = vadd.f32 %v790_v56, %v580_v53 }
  0xeb   : > { %v929_v61 = vadd.f32 %v3098_v22, %v853_v58  ;;  %v930_v62 = vadd.f32 %v3101_v27, %v854_v59  ;;  %v453_v2 = vpop.permute.xlu1 %452  ;;  %v703_v58 = vpop.permute.xlu0 %702  ;;  %v2768_v59 = vld [vmem:[%s3712_s5 + $0x10] ss:$8 sps:$4 sm:$0xff]  }
  0xec   : > { %v581_v16 = vmul.f32 %v3083_v12, %v453_v2  ;;  %v582_v17 = vmul.f32 %v3086_v13, %v453_v2 }
  0xed   : > { %v994_v6 = vmax.f32 %v930_v62, 0.0  ;;  %v993_v7 = vmax.f32 %v929_v61, 0.0 }
  0xef   : > { %v1042_v9 = vpack.c.bf16 %v994_v6, %v992_v4  ;;  %v1041_v14 = vpack.c.bf16 %v993_v7, %v991_v5  ;;  %v1000_v4 = vmax.f32 %v936_v48, 0.0  ;;  %v999_v5 = vmax.f32 %v935_v47, 0.0 }
  0xf0   : > { %v679_v15 = vpop.permute.xlu1 %678 }
  0xf1   : > { %v791_v18 = vmul.f32 %v3077_v10, %v679_v15  ;;  %v792_v19 = vmul.f32 %v3080_v11, %v679_v15  ;;  %1365 = vmatprep.mubr.bf16.mxu0 %v1042_v9  ;;  %v2776_v9 = vld [vmem:[%s3712_s5 + $0x34] ss:$8 sps:$4 sm:$0xff]  }
  0xf2   : > { %1366 = vmatmul.mubr.bf16.gmra.mrb[28].mxu0 %v1041_v14 }
  0xf3   : > { %v855_v20 = vadd.f32 %v791_v18, %v581_v16  ;;  %v856_v21 = vadd.f32 %v792_v19, %v582_v17  ;;  %v478_v16 = vpop.permute.xlu0 %477 }
  0xf4   : > { %v683_v26 = vpop.permute.xlu1 %682 }
  0xf5   : > { %v793_v54 = vmul.f32 %v3077_v10, %v683_v26  ;;  %v794_v57 = vmul.f32 %v3080_v11, %v683_v26  ;;  %v931_v32 = vadd.f32 %v3098_v22, %v855_v20  ;;  %v932_v35 = vadd.f32 %v3101_v27, %v856_v21 }
  0xf7   : > { %v857_v33 = vadd.f32 %v793_v54, %v583_v23  ;;  %v858_v34 = vadd.f32 %v794_v57, %v584_v24  ;;  %v996_v40 = vmax.f32 %v932_v35, 0.0  ;;  %v995_v42 = vmax.f32 %v931_v32, 0.0  ;;  %v2774_v23 = vld [vmem:[%s3712_s5 + $0x30] ss:$8 sps:$4 sm:$0xff]   ;;  %v2779_v24 = vld [vmem:[%s3712_s5 + $0x44] ss:$8 sps:$4 sm:$0xff]   ;;  %v483_v28 = vpop.permute.xlu0 %482 }
  0xf8   : > { %v591_v54 = vmul.f32 %v3083_v12, %v478_v16  ;;  %v592_v57 = vmul.f32 %v3086_v13, %v478_v16  ;;  %v2777_v32 = vld [vmem:[%s3712_s5 + $0x40] ss:$8 sps:$4 sm:$0xff]   ;;  %v593_v35 = vmul.f32 %v3083_v12, %v483_v28 }
  0xf9   : > { %v933_v36 = vadd.f32 %v3098_v22, %v857_v33  ;;  %v468_v1 = vpop.permute.xlu1 %467  ;;  %v934_v37 = vadd.f32 %v3101_v27, %v858_v34  ;;  %v803_v33 = vmul.f32 %v3077_v10, %v703_v58  ;;  %v804_v34 = vmul.f32 %v3080_v11, %v703_v58 }
  0xfa   : > { %v587_v50 = vmul.f32 %v3083_v12, %v468_v1  ;;  %v588_v51 = vmul.f32 %v3086_v13, %v468_v1  ;;  %v2782_v1 = vld [vmem:[%s3712_s5 + $0x54] ss:$8 sps:$4 sm:$0xff]  }
  0xfb   : > { %v998_v41 = vmax.f32 %v934_v37, 0.0  ;;  %v997_v43 = vmax.f32 %v933_v36, 0.0  ;;  %v594_v36 = vmul.f32 %v3086_v13, %v483_v28 }
  0xfd   : > { %v1044_v44 = vpack.c.bf16 %v998_v41, %v996_v40  ;;  %v1043_v0 = vpack.c.bf16 %v997_v43, %v995_v42 }
  0xfe   : > { %v691_v46 = vpop.permute.xlu1 %690 }
  0xff   : > { %v797_v52 = vmul.f32 %v3077_v10, %v691_v46  ;;  %v798_v53 = vmul.f32 %v3080_v11, %v691_v46  ;;  %1375 = vmatprep.mubr.bf16.mxu1 %v1044_v44  ;;  %v2780_v44 = vld [vmem:[%s3712_s5 + $0x50] ss:$8 sps:$4 sm:$0xff]   ;;  %v2785_v46 = vld [vmem:[%s3712_s5 + $0x64] ss:$8 sps:$4 sm:$0xff]  }
 0x100   : > { %1376 = vmatmul.mubr.bf16.vlgmr.msra.gmra.mrb[0].mxu1 %v1043_v0  ;;  %v867_v0 = vadd.f32 %v803_v33, %v593_v35 }
 0x101   : > { %v861_v55 = vadd.f32 %v797_v52, %v587_v50  ;;  %v862_v56 = vadd.f32 %v798_v53, %v588_v51  ;;  %1757 = vmatpush1.bf16.msra.mxu1 %v2765_v45  ;;  %v868_v45 = vadd.f32 %v804_v34, %v594_v36  ;;  %v2783_v53 = vld [vmem:[%s3712_s5 + $0x60] ss:$8 sps:$4 sm:$0xff]  }
 0x102   : > { %1758 = vmatprep.subr.bf16.mxu1 %v2770_v49 }
 0x103   : > { %v937_v61 = vadd.f32 %v3098_v22, %v861_v55  ;;  %v938_v62 = vadd.f32 %v3101_v27, %v862_v56  ;;  %v473_v2 = vpop.permute.xlu1 %472  ;;  %v943_v55 = vadd.f32 %v3098_v22, %v867_v0  ;;  %v944_v56 = vadd.f32 %v3101_v27, %v868_v45 }
 0x104   : > { %v589_v17 = vmul.f32 %v3083_v12, %v473_v2  ;;  %v590_v19 = vmul.f32 %v3086_v13, %v473_v2 }
 0x105   : > { %v1002_v6 = vmax.f32 %v938_v62, 0.0  ;;  %v1001_v7 = vmax.f32 %v937_v61, 0.0  ;;  %1759 = vmatpush1.bf16.msra.mxu1 %v2768_v59  ;;  %v2788_v59 = vld [vmem:[%s3712_s5 + $0x74] ss:$8 sps:$4 sm:$0xff]   ;;  %v1008_v16 = vmax.f32 %v944_v56, 0.0 }
 0x106   : > { %1760 = vmatprep.subr.bf16.mxu1 %v2773_v60 }
 0x107   : > { %v1046_v14 = vpack.c.bf16 %v1002_v6, %v1000_v4  ;;  %v1045_v15 = vpack.c.bf16 %v1001_v7, %v999_v5  ;;  %v2786_v6 = vld [vmem:[%s3712_s5 + $0x70] ss:$8 sps:$4 sm:$0xff]   ;;  %v2791_v7 = vld [vmem:[%s3712_s5 + $0x84] ss:$8 sps:$4 sm:$0xff]  }
 0x108   : > { %v695_v18 = vpop.permute.xlu1 %694 }
 0x109   : > { %v799_v20 = vmul.f32 %v3077_v10, %v695_v18  ;;  %v800_v21 = vmul.f32 %v3080_v11, %v695_v18  ;;  %1385 = vmatprep.mubr.bf16.mxu1 %v1046_v14  ;;  %1761 = vmatpush1.bf16.msra.mxu1 %v2771_v8 }
 0x10a   : > { %1386 = vmatmul.mubr.bf16.gmra.mrb[4].mxu1 %v1045_v15  ;;  %1762 = vmatprep.subr.bf16.mxu1 %v2776_v9  ;;  %v498_v15 = vpop.permute.xlu0 %497 }
 0x10b   : > { %v863_v25 = vadd.f32 %v799_v20, %v589_v17  ;;  %v864_v26 = vadd.f32 %v800_v21, %v590_v19  ;;  %v1007_v17 = vmax.f32 %v943_v55, 0.0  ;;  %v2789_v20 = vld [vmem:[%s3712_s5 + $0x80] ss:$8 sps:$4 sm:$0xff]   ;;  %v2794_v21 = vld [vmem:[%s3712_s5 + $0x94] ss:$8 sps:$4 sm:$0xff]   ;;  %v599_v35 = vmul.f32 %v3083_v12, %v498_v15 }
 0x10c   : > { %v699_v29 = vpop.permute.xlu1 %698  ;;  %v600_v36 = vmul.f32 %v3086_v13, %v498_v15  ;;  %v2803_v55 = vld [vmem:[%s3712_s5 + $0xc4] ss:$8 sps:$4 sm:$0xff]  }
 0x10d   : > { %v801_v30 = vmul.f32 %v3077_v10, %v699_v29  ;;  %v802_v31 = vmul.f32 %v3080_v11, %v699_v29  ;;  %1763 = vmatpush1.bf16.msra.mxu1 %v2774_v23  ;;  %v939_v37 = vadd.f32 %v3098_v22, %v863_v25  ;;  %v940_v38 = vadd.f32 %v3101_v27, %v864_v26 }
 0x10e   : > { %1764 = vmatprep.subr.bf16.mxu1 %v2779_v24  ;;  %v719_v25 = vpop.permute.xlu0 %718 }
 0x10f   : > { %v865_v39 = vadd.f32 %v801_v30, %v591_v54  ;;  %v866_v40 = vadd.f32 %v802_v31, %v592_v57  ;;  %v1004_v47 = vmax.f32 %v940_v38, 0.0  ;;  %v1003_v49 = vmax.f32 %v939_v37, 0.0  ;;  %v2792_v30 = vld [vmem:[%s3712_s5 + $0x90] ss:$8 sps:$4 sm:$0xff]   ;;  %v2797_v31 = vld [vmem:[%s3712_s5 + $0xa4] ss:$8 sps:$4 sm:$0xff]  }
 0x111   : > { %v941_v41 = vadd.f32 %v3098_v22, %v865_v39  ;;  %v942_v42 = vadd.f32 %v3101_v27, %v866_v40  ;;  %v488_v43 = vpop.permute.xlu1 %487  ;;  %1765 = vmatpush1.bf16.msra.mxu1 %v2777_v32  ;;  %v2795_v39 = vld [vmem:[%s3712_s5 + $0xa0] ss:$8 sps:$4 sm:$0xff]   ;;  %v811_v40 = vmul.f32 %v3077_v10, %v719_v25 }
 0x112   : > { %1766 = vmatprep.subr.bf16.mxu1 %v2782_v1  ;;  %v595_v60 = vmul.f32 %v3083_v12, %v488_v43  ;;  %v596_v61 = vmul.f32 %v3086_v13, %v488_v43  ;;  %v503_v38 = vpop.permute.xlu0 %502 }
 0x113   : > { %v1006_v48 = vmax.f32 %v942_v42, 0.0  ;;  %v1005_v50 = vmax.f32 %v941_v41, 0.0  ;;  %v812_v41 = vmul.f32 %v3080_v11, %v719_v25  ;;  %v601_v42 = vmul.f32 %v3083_v12, %v503_v38 }
 0x114   : > { %v602_v43 = vmul.f32 %v3086_v13, %v503_v38 }
 0x115   : > { %v1048_v51 = vpack.c.bf16 %v1006_v48, %v1004_v47  ;;  %v1047_v52 = vpack.c.bf16 %v1005_v50, %v1003_v49  ;;  %1767 = vmatpush1.bf16.msra.mxu1 %v2780_v44  ;;  %v2800_v44 = vld [vmem:[%s3712_s5 + $0xb4] ss:$8 sps:$4 sm:$0xff]  }
 0x116   : > { %v707_v58 = vpop.permute.xlu1 %706  ;;  %1768 = vmatprep.subr.bf16.mxu1 %v2785_v46 }
 0x117   : > { %v805_v62 = vmul.f32 %v3077_v10, %v707_v58  ;;  %v806_v2 = vmul.f32 %v3080_v11, %v707_v58  ;;  %1395 = vmatprep.mubr.bf16.mxu1 %v1048_v51  ;;  %v2798_v51 = vld [vmem:[%s3712_s5 + $0xb0] ss:$8 sps:$4 sm:$0xff]  }
 0x118   : > { %1396 = vmatmul.mubr.bf16.gmra.mrb[8].mxu1 %v1047_v52  ;;  %v875_v52 = vadd.f32 %v811_v40, %v601_v42 }
 0x119   : > { %v869_v4 = vadd.f32 %v805_v62, %v595_v60  ;;  %v870_v5 = vadd.f32 %v806_v2, %v596_v61  ;;  %1769 = vmatpush1.bf16.msra.mxu1 %v2783_v53  ;;  %v876_v53 = vadd.f32 %v812_v41, %v602_v43  ;;  %v2801_v2 = vld [vmem:[%s3712_s5 + $0xc0] ss:$8 sps:$4 sm:$0xff]  }
 0x11a   : > { %1770 = vmatprep.subr.bf16.mxu1 %v2788_v59 }
 0x11b   : > { %v945_v8 = vadd.f32 %v3098_v22, %v869_v4  ;;  %v946_v9 = vadd.f32 %v3101_v27, %v870_v5  ;;  %v493_v14 = vpop.permute.xlu1 %492  ;;  %v951_v4 = vadd.f32 %v3098_v22, %v875_v52  ;;  %v952_v5 = vadd.f32 %v3101_v27, %v876_v53 }
 0x11c   : > { %v597_v26 = vmul.f32 %v3083_v12, %v493_v14  ;;  %v598_v57 = vmul.f32 %v3086_v13, %v493_v14 }
 0x11d   : > { %v1010_v18 = vmax.f32 %v946_v9, 0.0  ;;  %v1009_v19 = vmax.f32 %v945_v8, 0.0  ;;  %1771 = vmatpush1.bf16.msra.mxu1 %v2786_v6  ;;  %v1016_v25 = vmax.f32 %v952_v5, 0.0 }
 0x11e   : > { %1772 = vmatprep.subr.bf16.mxu1 %v2791_v7  ;;  %v2806_v7 = vld [vmem:[%s3712_s5 + $0xd4] ss:$8 sps:$4 sm:$0xff]  }
 0x11f   : > { %v1050_v23 = vpack.c.bf16 %v1010_v18, %v1008_v16  ;;  %v1049_v24 = vpack.c.bf16 %v1009_v19, %v1007_v17  ;;  %v2804_v18 = vld [vmem:[%s3712_s5 + $0xd0] ss:$8 sps:$4 sm:$0xff]   ;;  %v518_v19 = vpop.permute.xlu0 %517 }
 0x120   : > { %v711_v54 = vpop.permute.xlu1 %710  ;;  %v607_v41 = vmul.f32 %v3083_v12, %v518_v19  ;;  %v608_v42 = vmul.f32 %v3086_v13, %v518_v19 }
 0x121   : > { %v807_v28 = vmul.f32 %v3077_v10, %v711_v54  ;;  %v808_v29 = vmul.f32 %v3080_v11, %v711_v54  ;;  %1405 = vmatprep.mubr.bf16.mxu1 %v1050_v23  ;;  %1773 = vmatpush1.bf16.msra.mxu1 %v2789_v20  ;;  %v2809_v20 = vld [vmem:[%s3712_s5 + $0xe4] ss:$8 sps:$4 sm:$0xff]  }
 0x122   : > { %1406 = vmatmul.mubr.bf16.gmra.mrb[12].mxu1 %v1049_v24  ;;  %1774 = vmatprep.subr.bf16.mxu1 %v2794_v21 }
 0x123   : > { %v871_v32 = vadd.f32 %v807_v28, %v597_v26  ;;  %v872_v33 = vadd.f32 %v808_v29, %v598_v57  ;;  %v1015_v26 = vmax.f32 %v951_v4, 0.0  ;;  %v2807_v28 = vld [vmem:[%s3712_s5 + $0xe0] ss:$8 sps:$4 sm:$0xff]   ;;  %v2812_v29 = vld [vmem:[%s3712_s5 + $0xf4] ss:$8 sps:$4 sm:$0xff]  }
 0x124   : > { %v715_v34 = vpop.permute.xlu1 %714 }
 0x125   : > { %v809_v1 = vmul.f32 %v3077_v10, %v715_v34  ;;  %v810_v37 = vmul.f32 %v3080_v11, %v715_v34  ;;  %1775 = vmatpush1.bf16.msra.mxu1 %v2792_v30  ;;  %v947_v0 = vadd.f32 %v3098_v22, %v871_v32  ;;  %v948_v45 = vadd.f32 %v3101_v27, %v872_v33  ;;  %v523_v32 = vpop.permute.xlu0 %522 }
 0x126   : > { %1776 = vmatprep.subr.bf16.mxu1 %v2797_v31 }
 0x127   : > { %v873_v46 = vadd.f32 %v809_v1, %v599_v35  ;;  %v874_v47 = vadd.f32 %v810_v37, %v600_v36  ;;  %v1012_v56 = vmax.f32 %v948_v45, 0.0  ;;  %v1011_v59 = vmax.f32 %v947_v0, 0.0  ;;  %v2810_v37 = vld [vmem:[%s3712_s5 + $0xf0] ss:$8 sps:$4 sm:$0xff]  }
 0x129   : > { %v949_v48 = vadd.f32 %v3098_v22, %v873_v46  ;;  %v950_v49 = vadd.f32 %v3101_v27, %v874_v47  ;;  %v508_v50 = vpop.permute.xlu1 %507  ;;  %1777 = vmatpush1.bf16.msra.mxu1 %v2795_v39  ;;  %v735_v0 = vpop.permute.xlu0 %734 }
 0x12a   : > { %1778 = vmatprep.subr.bf16.mxu1 %v2800_v44  ;;  %v603_v8 = vmul.f32 %v3083_v12, %v508_v50  ;;  %v604_v9 = vmul.f32 %v3086_v13, %v508_v50  ;;  %v610_v50 = vmul.f32 %v3086_v13, %v523_v32  ;;  %v820_v52 = vmul.f32 %v3080_v11, %v735_v0 }
 0x12b   : > { %v1014_v58 = vmax.f32 %v950_v49, 0.0  ;;  %v1013_v60 = vmax.f32 %v949_v48, 0.0  ;;  %v609_v49 = vmul.f32 %v3083_v12, %v523_v32 }
 0x12d   : > { %v1052_v61 = vpack.c.bf16 %v1014_v58, %v1012_v56  ;;  %v1051_v62 = vpack.c.bf16 %v1013_v60, %v1011_v59  ;;  %1779 = vmatpush1.bf16.msra.mxu1 %v2798_v51  ;;  %v819_v51 = vmul.f32 %v3077_v10, %v735_v0 }
 0x12e   : > { %v723_v6 = vpop.permute.xlu1 %722  ;;  %1780 = vmatprep.subr.bf16.mxu1 %v2803_v55 }
 0x12f   : > { %v813_v14 = vmul.f32 %v3077_v10, %v723_v6  ;;  %v814_v15 = vmul.f32 %v3080_v11, %v723_v6  ;;  %1415 = vmatprep.mubr.bf16.mxu1 %v1052_v61 }
 0x130   : > { %1416 = vmatmul.mubr.bf16.gmra.mrb[16].mxu1 %v1051_v62  ;;  %v883_v62 = vadd.f32 %v819_v51, %v609_v49 }
 0x131   : > { %v877_v16 = vadd.f32 %v813_v14, %v603_v8  ;;  %v878_v17 = vadd.f32 %v814_v15, %v604_v9  ;;  %1781 = vmatpush1.bf16.msra.mxu1 %v2801_v2  ;;  %v884_v2 = vadd.f32 %v820_v52, %v610_v50 }
 0x132   : > { %1782 = vmatprep.subr.bf16.mxu1 %v2806_v7  ;;  %v959_v15 = vadd.f32 %v3098_v22, %v883_v62 }
 0x133   : > { %v953_v21 = vadd.f32 %v3098_v22, %v877_v16  ;;  %v954_v23 = vadd.f32 %v3101_v27, %v878_v17  ;;  %v513_v24 = vpop.permute.xlu1 %512  ;;  %v960_v16 = vadd.f32 %v3101_v27, %v884_v2 }
 0x134   : > { %v605_v33 = vmul.f32 %v3083_v12, %v513_v24  ;;  %v606_v35 = vmul.f32 %v3086_v13, %v513_v24 }
 0x135   : > { %v1018_v54 = vmax.f32 %v954_v23, 0.0  ;;  %v1017_v57 = vmax.f32 %v953_v21, 0.0  ;;  %1783 = vmatpush1.bf16.msra.mxu1 %v2804_v18  ;;  %v1023_v21 = vmax.f32 %v959_v15, 0.0 }
 0x136   : > { %1784 = vmatprep.subr.bf16.mxu1 %v2809_v20 }
 0x137   : > { %v1054_v30 = vpack.c.bf16 %v1018_v54, %v1016_v25  ;;  %v1053_v31 = vpack.c.bf16 %v1017_v57, %v1015_v26 }
 0x138   : > { %v727_v34 = vpop.permute.xlu1 %726 }
 0x139   : > { %v815_v36 = vmul.f32 %v3077_v10, %v727_v34  ;;  %v816_v1 = vmul.f32 %v3080_v11, %v727_v34  ;;  %1425 = vmatprep.mubr.bf16.mxu1 %v1054_v30  ;;  %1785 = vmatpush1.bf16.msra.mxu1 %v2807_v28 }
 0x13a   : > { %1426 = vmatmul.mubr.bf16.gmra.mrb[20].mxu1 %v1053_v31  ;;  %1786 = vmatprep.subr.bf16.mxu1 %v2812_v29 }
 0x13b   : > { %v879_v38 = vadd.f32 %v815_v36, %v605_v33  ;;  %v880_v39 = vadd.f32 %v816_v1, %v606_v35 }
 0x13c   : > { %v731_v40 = vpop.permute.xlu1 %730 }
 0x13d   : > { %v817_v43 = vmul.f32 %v3077_v10, %v731_v40  ;;  %v818_v44 = vmul.f32 %v3080_v11, %v731_v40  ;;  %1787 = vmatpush1.bf16.msra.mxu1 %v2810_v37  ;;  %v955_v45 = vadd.f32 %v3098_v22, %v879_v38  ;;  %v956_v46 = vadd.f32 %v3101_v27, %v880_v39 }
 0x13f   : > { %v881_v47 = vadd.f32 %v817_v43, %v607_v41  ;;  %v882_v48 = vadd.f32 %v818_v44, %v608_v42  ;;  %v1020_v58 = vmax.f32 %v956_v46, 0.0  ;;  %v1019_v60 = vmax.f32 %v955_v45, 0.0 }
 0x141   : > { %v957_v53 = vadd.f32 %v3098_v22, %v881_v47  ;;  %v958_v55 = vadd.f32 %v3101_v27, %v882_v48  ;;  %v528_v56 = vpop.permute.xlu1 %527 }
 0x142   : > { %v611_v7 = vmul.f32 %v3083_v12, %v528_v56  ;;  %v612_v8 = vmul.f32 %v3086_v13, %v528_v56  ;;  %v1024_v12 = vmax.f32 %v960_v16, 0.0 }
 0x143   : > { %v1022_v59 = vmax.f32 %v958_v55, 0.0  ;;  %v1021_v61 = vmax.f32 %v957_v53, 0.0 }
 0x145   : > { %v1056_v4 = vpack.c.bf16 %v1022_v59, %v1020_v58  ;;  %v1055_v5 = vpack.c.bf16 %v1021_v61, %v1019_v60 }
 0x146   : > { %v739_v6 = vpop.permute.xlu1 %738 }
 0x147   : > { %v821_v9 = vmul.f32 %v3077_v10, %v739_v6  ;;  %v822_v14 = vmul.f32 %v3080_v11, %v739_v6  ;;  %1435 = vmatprep.mubr.bf16.mxu1 %v1056_v4  ;;  %v1091_v11 = vld [vmem:[%s3711_s4] sm:$0x3] }
 0x148   : > { %1436 = vmatmul.mubr.bf16.gmra.mrb[24].mxu1 %v1055_v5  ;;  %v3406_v25 = vrot.slane %v1091_v11, %v3068_v3  ;;  %v3409_v26 = vrot.slane %v1091_v11, %v3066_v63 }
 0x149   : > { %v885_v17 = vadd.f32 %v821_v9, %v611_v7  ;;  %v886_v18 = vadd.f32 %v822_v14, %v612_v8 }
 0x14b   : > { %v961_v19 = vadd.f32 %v3098_v22, %v885_v17  ;;  %v962_v20 = vadd.f32 %v3101_v27, %v886_v18 }
 0x14d   : > { %v1025_v23 = vmax.f32 %v961_v19, 0.0  ;;  %v1026_v13 = vmax.f32 %v962_v20, 0.0 }
 0x14f   : > { %v1058_v24 = vpack.c.bf16 %v1026_v13, %v1024_v12  ;;  %v1057_v10 = vpack.c.bf16 %v1025_v23, %v1023_v21 }
 0x151   : > { %1445 = vmatprep.mubr.bf16.mxu1 %v1058_v24 }
 0x152   : > { %1446 = vmatmul.mubr.bf16.gmra.mrb[28].mxu1 %v1057_v10 }
 0x173   : > { %v1297_v22 = vpop.f32.mrb[0].mxu0 }
 0x174   : > { %v1298_v27 = vadd.f32 %v1297_v22, %v3406_v25  ;;  %v1299_v54 = vpop.f32.mrb[1].mxu0 }
 0x175   : > { %v1300_v57 = vadd.f32 %v1299_v54, %v3409_v26  ;;  %v1301_v28 = vpop.f32.mrb[2].mxu0 }
 0x176   : > { %v1302_v29 = vadd.f32 %v1301_v28, %v3406_v25  ;;  %v1303_v30 = vpop.f32.mrb[3].mxu0  ;;  %v1456_v32 = vmax.f32 %v1298_v27, 0.0 }
 0x177   : > { %v1304_v31 = vadd.f32 %v1303_v30, %v3409_v26  ;;  %v1457_v34 = vmax.f32 %v1300_v57, 0.0 }
 0x178   : > { %v1458_v33 = vmax.f32 %v1302_v29, 0.0 }
 0x179   : > { %v1459_v35 = vmax.f32 %v1304_v31, 0.0 }
 0x17a   : > { %v1520_v36 = vpack.c.bf16 %v1458_v33, %v1456_v32 }
 0x17b   : > { %v1521_v1 = vpack.c.bf16 %v1459_v35, %v1457_v34 }
 0x17d   : > { %v1307_v37 = vpop.f32.mrb[4].mxu0  ;;  %1788 = vmatprep.mubr.bf16.mxu1 %v1521_v1 }
 0x17e   : > { %v1308_v38 = vadd.f32 %v1307_v37, %v3406_v25  ;;  %v1309_v39 = vpop.f32.mrb[5].mxu0  ;;  %1789 = vmatmul.mubr.bf16.vlgmr.msra.gmra.mrb[32].mxu1 %v1520_v36 }
 0x17f   : > { %v1310_v40 = vadd.f32 %v1309_v39, %v3409_v26  ;;  %v1311_v41 = vpop.f32.mrb[6].mxu0 }
 0x180   : > { %v1312_v42 = vadd.f32 %v1311_v41, %v3406_v25  ;;  %v1313_v43 = vpop.f32.mrb[7].mxu0  ;;  %v1460_v0 = vmax.f32 %v1308_v38, 0.0  ;;  %v2814_v41 = vld [vmem:[%s3714_s7] sm:$0xff]  }
 0x181   : > { %v1314_v44 = vadd.f32 %v1313_v43, %v3409_v26  ;;  %v1461_v46 = vmax.f32 %v1310_v40, 0.0  ;;  %v2813_v40 = vld [vmem:[%s3714_s7 + $0x40] sm:$0xff]  }
 0x182   : > { %v1462_v45 = vmax.f32 %v1312_v42, 0.0  ;;  %v2815_v42 = vld [vmem:[%s3714_s7 + $0x48] sm:$0xff]   ;;  %2522 = vmatprep.subr.bf16.mxu0 %v2813_v40  ;;  %v2828_v40 = vld [vmem:[%s3714_s7 + $0x38] sm:$0xff]  }
 0x183   : > { %v1463_v47 = vmax.f32 %v1314_v44, 0.0  ;;  %2523 = vmatpush3.bf16.msra.mxu0 %v2814_v41 }
 0x184   : > { %v1522_v48 = vpack.c.bf16 %v1462_v45, %v1460_v0  ;;  %2524 = vmatprep.subr.bf16.mxu0 %v2815_v42 }
 0x185   : > { %v1523_v49 = vpack.c.bf16 %v1463_v47, %v1461_v46  ;;  %v2816_v47 = vld [vmem:[%s3714_s7 + $0x8] sm:$0xff]  }
 0x187   : > { %1798 = vmatprep.mubr.bf16.mxu1 %v1523_v49  ;;  %v2817_v49 = vld [vmem:[%s3714_s7 + $0x50] sm:$0xff]   ;;  %2525 = vmatpush3.bf16.msra.mxu0 %v2816_v47 }
 0x188   : > { %1799 = vmatmul.mubr.bf16.gmra.mrb[36].mxu1 %v1522_v48  ;;  %2526 = vmatprep.subr.bf16.mxu0 %v2817_v49 }
 0x18b   : > { %v1317_v50 = vpop.f32.mrb[8].mxu0 }
 0x18c   : > { %v1318_v51 = vadd.f32 %v1317_v50, %v3406_v25  ;;  %v1319_v52 = vpop.f32.mrb[9].mxu0 }
 0x18d   : > { %v1320_v53 = vadd.f32 %v1319_v52, %v3409_v26  ;;  %v1321_v55 = vpop.f32.mrb[10].mxu0  ;;  %v2819_v52 = vld [vmem:[%s3714_s7 + $0x58] sm:$0xff]  }
 0x18e   : > { %v1322_v56 = vadd.f32 %v1321_v55, %v3406_v25  ;;  %v1323_v58 = vpop.f32.mrb[11].mxu0  ;;  %v1464_v60 = vmax.f32 %v1318_v51, 0.0  ;;  %v2818_v51 = vld [vmem:[%s3714_s7 + $0x10] sm:$0xff]   ;;  %v2820_v55 = vld [vmem:[%s3714_s7 + $0x18] sm:$0xff]  }
 0x18f   : > { %v1324_v59 = vadd.f32 %v1323_v58, %v3409_v26  ;;  %v1465_v62 = vmax.f32 %v1320_v53, 0.0  ;;  %2527 = vmatpush3.bf16.msra.mxu0 %v2818_v51 }
 0x190   : > { %v1466_v61 = vmax.f32 %v1322_v56, 0.0  ;;  %2528 = vmatprep.subr.bf16.mxu0 %v2819_v52 }
 0x191   : > { %v1467_v2 = vmax.f32 %v1324_v59, 0.0  ;;  %v2821_v59 = vld [vmem:[%s3714_s7 + $0x60] sm:$0xff]  }
 0x192   : > { %v1524_v4 = vpack.c.bf16 %v1466_v61, %v1464_v60 }
 0x193   : > { %v1525_v5 = vpack.c.bf16 %v1467_v2, %v1465_v62  ;;  %2529 = vmatpush3.bf16.msra.mxu0 %v2820_v55 }
 0x194   : > { %2530 = vmatprep.subr.bf16.mxu0 %v2821_v59 }
 0x195   : > { %v1327_v6 = vpop.f32.mrb[12].mxu0  ;;  %1808 = vmatprep.mubr.bf16.mxu1 %v1525_v5  ;;  %v2822_v5 = vld [vmem:[%s3714_s7 + $0x20] sm:$0xff]  }
 0x196   : > { %v1328_v7 = vadd.f32 %v1327_v6, %v3406_v25  ;;  %v1329_v8 = vpop.f32.mrb[13].mxu0  ;;  %1809 = vmatmul.mubr.bf16.gmra.mrb[40].mxu1 %v1524_v4 }
 0x197   : > { %v1330_v9 = vadd.f32 %v1329_v8, %v3409_v26  ;;  %v1331_v14 = vpop.f32.mrb[14].mxu0  ;;  %v2823_v8 = vld [vmem:[%s3714_s7 + $0x68] sm:$0xff]   ;;  %2531 = vmatpush3.bf16.msra.mxu0 %v2822_v5 }
 0x198   : > { %v1332_v15 = vadd.f32 %v1331_v14, %v3406_v25  ;;  %v1333_v16 = vpop.f32.mrb[15].mxu0  ;;  %v1468_v18 = vmax.f32 %v1328_v7, 0.0  ;;  %2532 = vmatprep.subr.bf16.mxu0 %v2823_v8 }
 0x199   : > { %v1334_v17 = vadd.f32 %v1333_v16, %v3409_v26  ;;  %v1469_v20 = vmax.f32 %v1330_v9, 0.0 }
 0x19a   : > { %v1470_v19 = vmax.f32 %v1332_v15, 0.0 }
 0x19b   : > { %v1471_v21 = vmax.f32 %v1334_v17, 0.0 }
 0x19c   : > { %v1526_v12 = vpack.c.bf16 %v1470_v19, %v1468_v18 }
 0x19d   : > { %v1527_v23 = vpack.c.bf16 %v1471_v21, %v1469_v20 }
 0x19f   : > { %1818 = vmatprep.mubr.bf16.mxu1 %v1527_v23 }
 0x1a0   : > { %1819 = vmatmul.mubr.bf16.gmra.mrb[44].mxu1 %v1526_v12 }
 0x1a3   : > { %v1337_v13 = vpop.f32.mrb[16].mxu0 }
 0x1a4   : > { %v1338_v24 = vadd.f32 %v1337_v13, %v3406_v25  ;;  %v1339_v10 = vpop.f32.mrb[17].mxu0 }
 0x1a5   : > { %v1340_v11 = vadd.f32 %v1339_v10, %v3409_v26  ;;  %v1341_v22 = vpop.f32.mrb[18].mxu0 }
 0x1a6   : > { %v1342_v27 = vadd.f32 %v1341_v22, %v3406_v25  ;;  %v1343_v54 = vpop.f32.mrb[19].mxu0  ;;  %v1472_v28 = vmax.f32 %v1338_v24, 0.0 }
 0x1a7   : > { %v1344_v57 = vadd.f32 %v1343_v54, %v3409_v26  ;;  %v1473_v30 = vmax.f32 %v1340_v11, 0.0 }
 0x1a8   : > { %v1474_v29 = vmax.f32 %v1342_v27, 0.0 }
 0x1a9   : > { %v1475_v31 = vmax.f32 %v1344_v57, 0.0  ;;  %v2824_v57 = vld [vmem:[%s3714_s7 + $0x28] sm:$0xff]  }
 0x1aa   : > { %v1528_v32 = vpack.c.bf16 %v1474_v29, %v1472_v28  ;;  %2533 = vmatpush3.bf16.msra.mxu0 %v2824_v57  ;;  %v2825_v29 = vld [vmem:[%s3714_s7 + $0x70] sm:$0xff]  }
 0x1ab   : > { %v1529_v33 = vpack.c.bf16 %v1475_v31, %v1473_v30  ;;  %2534 = vmatprep.subr.bf16.mxu0 %v2825_v29 }
 0x1ad   : > { %v1347_v34 = vpop.f32.mrb[20].mxu0  ;;  %1828 = vmatprep.mubr.bf16.mxu1 %v1529_v33 }
 0x1ae   : > { %v1348_v35 = vadd.f32 %v1347_v34, %v3406_v25  ;;  %v1349_v36 = vpop.f32.mrb[21].mxu0  ;;  %1829 = vmatmul.mubr.bf16.gmra.mrb[48].mxu1 %v1528_v32  ;;  %v2826_v32 = vld [vmem:[%s3714_s7 + $0x30] sm:$0xff]  }
 0x1af   : > { %v1350_v1 = vadd.f32 %v1349_v36, %v3409_v26  ;;  %v1351_v37 = vpop.f32.mrb[22].mxu0  ;;  %2535 = vmatpush3.bf16.msra.mxu0 %v2826_v32 }
 0x1b0   : > { %v1352_v38 = vadd.f32 %v1351_v37, %v3406_v25  ;;  %v1353_v39 = vpop.f32.mrb[23].mxu0  ;;  %v1476_v44 = vmax.f32 %v1348_v35, 0.0  ;;  %v2827_v37 = vld [vmem:[%s3714_s7 + $0x78] sm:$0xff]  }
 0x1b1   : > { %v1354_v43 = vadd.f32 %v1353_v39, %v3409_v26  ;;  %v1477_v45 = vmax.f32 %v1350_v1, 0.0  ;;  %2536 = vmatprep.subr.bf16.mxu0 %v2827_v37 }
 0x1b2   : > { %v1478_v0 = vmax.f32 %v1352_v38, 0.0 }
 0x1b3   : > { %v1479_v46 = vmax.f32 %v1354_v43, 0.0  ;;  %2537 = vmatpush3.bf16.msra.mxu0 %v2828_v40 }
 0x1b4   : > { %v1530_v48 = vpack.c.bf16 %v1478_v0, %v1476_v44 }
 0x1b5   : > { %v1531_v50 = vpack.c.bf16 %v1479_v46, %v1477_v45 }
 0x1b7   : > { %1838 = vmatprep.mubr.bf16.mxu1 %v1531_v50 }
 0x1b8   : > { %1839 = vmatmul.mubr.bf16.gmra.mrb[52].mxu1 %v1530_v48 }
 0x1bb   : > { %v1357_v53 = vpop.f32.mrb[24].mxu0 }
 0x1bc   : > { %v1358_v56 = vadd.f32 %v1357_v53, %v3406_v25  ;;  %v1359_v58 = vpop.f32.mrb[25].mxu0 }
 0x1bd   : > { %v1360_v60 = vadd.f32 %v1359_v58, %v3409_v26  ;;  %v1361_v61 = vpop.f32.mrb[26].mxu0 }
 0x1be   : > { %v1362_v62 = vadd.f32 %v1361_v61, %v3406_v25  ;;  %v1363_v2 = vpop.f32.mrb[27].mxu0  ;;  %v1480_v6 = vmax.f32 %v1358_v56, 0.0 }
 0x1bf   : > { %v1364_v4 = vadd.f32 %v1363_v2, %v3409_v26  ;;  %v1481_v9 = vmax.f32 %v1360_v60, 0.0 }
 0x1c0   : > { %v1482_v7 = vmax.f32 %v1362_v62, 0.0 }
 0x1c1   : > { %v1483_v14 = vmax.f32 %v1364_v4, 0.0 }
 0x1c2   : > { %v1532_v15 = vpack.c.bf16 %v1482_v7, %v1480_v6 }
 0x1c3   : > { %v1533_v16 = vpack.c.bf16 %v1483_v14, %v1481_v9 }
 0x1c5   : > { %v1367_v17 = vpop.f32.mrb[28].mxu0  ;;  %1848 = vmatprep.mubr.bf16.mxu1 %v1533_v16 }
 0x1c6   : > { %v1368_v18 = vadd.f32 %v1367_v17, %v3406_v25  ;;  %v1369_v19 = vpop.f32.mrb[29].mxu0  ;;  %1849 = vmatmul.mubr.bf16.gmra.mrb[56].mxu1 %v1532_v15 }
 0x1c7   : > { %v1370_v20 = vadd.f32 %v1369_v19, %v3409_v26  ;;  %v1371_v21 = vpop.f32.mrb[30].mxu0 }
 0x1c8   : > { %v1372_v12 = vadd.f32 %v1371_v21, %v3406_v25  ;;  %v1373_v23 = vpop.f32.mrb[31].mxu0  ;;  %v1484_v24 = vmax.f32 %v1368_v18, 0.0 }
 0x1c9   : > { %v1374_v13 = vadd.f32 %v1373_v23, %v3409_v26  ;;  %v1485_v11 = vmax.f32 %v1370_v20, 0.0 }
 0x1ca   : > { %v1486_v10 = vmax.f32 %v1372_v12, 0.0 }
 0x1cb   : > { %v1487_v22 = vmax.f32 %v1374_v13, 0.0 }
 0x1cc   : > { %v1534_v27 = vpack.c.bf16 %v1486_v10, %v1484_v24 }
 0x1cd   : > { %v1535_v54 = vpack.c.bf16 %v1487_v22, %v1485_v11 }
 0x1cf   : > { %1858 = vmatprep.mubr.bf16.mxu1 %v1535_v54 }
 0x1d0   : > { %1859 = vmatmul.mubr.bf16.gmra.mrb[60].mxu1 %v1534_v27 }
 0x1d3   : > { %v1377_v28 = vpop.f32.mrb[0].mxu1 }
 0x1d4   : > { %v1378_v30 = vadd.f32 %v1377_v28, %v3406_v25  ;;  %v1379_v31 = vpop.f32.mrb[1].mxu1 }
 0x1d5   : > { %v1380_v33 = vadd.f32 %v1379_v31, %v3409_v26  ;;  %v1381_v34 = vpop.f32.mrb[2].mxu1 }
 0x1d6   : > { %v1382_v35 = vadd.f32 %v1381_v34, %v3406_v25  ;;  %v1383_v36 = vpop.f32.mrb[3].mxu1  ;;  %v1488_v38 = vmax.f32 %v1378_v30, 0.0 }
 0x1d7   : > { %v1384_v1 = vadd.f32 %v1383_v36, %v3409_v26  ;;  %v1489_v41 = vmax.f32 %v1380_v33, 0.0 }
 0x1d8   : > { %v1490_v39 = vmax.f32 %v1382_v35, 0.0 }
 0x1d9   : > { %v1491_v42 = vmax.f32 %v1384_v1, 0.0 }
 0x1da   : > { %v1536_v43 = vpack.c.bf16 %v1490_v39, %v1488_v38 }
 0x1db   : > { %v1537_v44 = vpack.c.bf16 %v1491_v42, %v1489_v41 }
 0x1dd   : > { %v1387_v0 = vpop.f32.mrb[4].mxu1  ;;  %1868 = vmatprep.mubr.bf16.mxu1 %v1537_v44 }
 0x1de   : > { %v1388_v45 = vadd.f32 %v1387_v0, %v3406_v25  ;;  %v1389_v46 = vpop.f32.mrb[5].mxu1  ;;  %1869 = vmatmul.mubr.bf16.gmra.mrb[64].mxu1 %v1536_v43 }
 0x1df   : > { %v1390_v47 = vadd.f32 %v1389_v46, %v3409_v26  ;;  %v1391_v48 = vpop.f32.mrb[6].mxu1 }
 0x1e0   : > { %v1392_v49 = vadd.f32 %v1391_v48, %v3406_v25  ;;  %v1393_v50 = vpop.f32.mrb[7].mxu1  ;;  %v1492_v52 = vmax.f32 %v1388_v45, 0.0 }
 0x1e1   : > { %v1394_v51 = vadd.f32 %v1393_v50, %v3409_v26  ;;  %v1493_v55 = vmax.f32 %v1390_v47, 0.0 }
 0x1e2   : > { %v1494_v53 = vmax.f32 %v1392_v49, 0.0 }
 0x1e3   : > { %v1495_v56 = vmax.f32 %v1394_v51, 0.0 }
 0x1e4   : > { %v1538_v58 = vpack.c.bf16 %v1494_v53, %v1492_v52 }
 0x1e5   : > { %v1539_v59 = vpack.c.bf16 %v1495_v56, %v1493_v55 }
 0x1e7   : > { %1878 = vmatprep.mubr.bf16.mxu1 %v1539_v59 }
 0x1e8   : > { %1879 = vmatmul.mubr.bf16.gmra.mrb[68].mxu1 %v1538_v58 }
 0x1eb   : > { %v1397_v60 = vpop.f32.mrb[8].mxu1 }
 0x1ec   : > { %v1398_v61 = vadd.f32 %v1397_v60, %v3406_v25  ;;  %v1399_v62 = vpop.f32.mrb[9].mxu1 }
 0x1ed   : > { %v1400_v2 = vadd.f32 %v1399_v62, %v3409_v26  ;;  %v1401_v4 = vpop.f32.mrb[10].mxu1 }
 0x1ee   : > { %v1402_v5 = vadd.f32 %v1401_v4, %v3406_v25  ;;  %v1403_v6 = vpop.f32.mrb[11].mxu1  ;;  %v1496_v8 = vmax.f32 %v1398_v61, 0.0 }
 0x1ef   : > { %v1404_v7 = vadd.f32 %v1403_v6, %v3409_v26  ;;  %v1497_v14 = vmax.f32 %v1400_v2, 0.0 }
 0x1f0   : > { %v1498_v9 = vmax.f32 %v1402_v5, 0.0 }
 0x1f1   : > { %v1499_v15 = vmax.f32 %v1404_v7, 0.0 }
 0x1f2   : > { %v1540_v16 = vpack.c.bf16 %v1498_v9, %v1496_v8 }
 0x1f3   : > { %v1541_v17 = vpack.c.bf16 %v1499_v15, %v1497_v14 }
 0x1f5   : > { %v1407_v18 = vpop.f32.mrb[12].mxu1  ;;  %1888 = vmatprep.mubr.bf16.mxu1 %v1541_v17 }
 0x1f6   : > { %v1408_v19 = vadd.f32 %v1407_v18, %v3406_v25  ;;  %v1409_v20 = vpop.f32.mrb[13].mxu1  ;;  %1889 = vmatmul.mubr.bf16.gmra.mrb[72].mxu1 %v1540_v16 }
 0x1f7   : > { %v1410_v21 = vadd.f32 %v1409_v20, %v3409_v26  ;;  %v1411_v12 = vpop.f32.mrb[14].mxu1 }
 0x1f8   : > { %v1412_v23 = vadd.f32 %v1411_v12, %v3406_v25  ;;  %v1413_v13 = vpop.f32.mrb[15].mxu1  ;;  %v1500_v10 = vmax.f32 %v1408_v19, 0.0 }
 0x1f9   : > { %v1414_v24 = vadd.f32 %v1413_v13, %v3409_v26  ;;  %v1501_v22 = vmax.f32 %v1410_v21, 0.0 }
 0x1fa   : > { %v1502_v11 = vmax.f32 %v1412_v23, 0.0 }
 0x1fb   : > { %v1503_v27 = vmax.f32 %v1414_v24, 0.0 }
 0x1fc   : > { %v1542_v54 = vpack.c.bf16 %v1502_v11, %v1500_v10 }
 0x1fd   : > { %v1543_v57 = vpack.c.bf16 %v1503_v27, %v1501_v22  ;;  %v1584_v22 = vld [vmem:[%s3713_s6] sm:$0x3] }
 0x1fe   : > { %v3527_v27 = vrot.slane %v1584_v22, %v3068_v3 }
 0x1ff   : > { %1898 = vmatprep.mubr.bf16.mxu1 %v1543_v57 }
 0x200   : > { %1899 = vmatmul.mubr.bf16.gmra.mrb[76].mxu1 %v1542_v54 }
 0x203   : > { %v1417_v28 = vpop.f32.mrb[16].mxu1 }
 0x204   : > { %v1418_v29 = vadd.f32 %v1417_v28, %v3406_v25  ;;  %v1419_v30 = vpop.f32.mrb[17].mxu1 }
 0x205   : > { %v1420_v31 = vadd.f32 %v1419_v30, %v3409_v26  ;;  %v1421_v32 = vpop.f32.mrb[18].mxu1 }
 0x206   : > { %v1422_v33 = vadd.f32 %v1421_v32, %v3406_v25  ;;  %v1423_v34 = vpop.f32.mrb[19].mxu1  ;;  %v1504_v36 = vmax.f32 %v1418_v29, 0.0 }
 0x207   : > { %v1424_v35 = vadd.f32 %v1423_v34, %v3409_v26  ;;  %v1505_v37 = vmax.f32 %v1420_v31, 0.0 }
 0x208   : > { %v1506_v1 = vmax.f32 %v1422_v33, 0.0 }
 0x209   : > { %v1507_v38 = vmax.f32 %v1424_v35, 0.0 }
 0x20a   : > { %v1544_v39 = vpack.c.bf16 %v1506_v1, %v1504_v36 }
 0x20b   : > { %v1545_v40 = vpack.c.bf16 %v1507_v38, %v1505_v37 }
 0x20d   : > { %v1427_v41 = vpop.f32.mrb[20].mxu1  ;;  %1908 = vmatprep.mubr.bf16.mxu1 %v1545_v40 }
 0x20e   : > { %v1428_v42 = vadd.f32 %v1427_v41, %v3406_v25  ;;  %v1429_v43 = vpop.f32.mrb[21].mxu1  ;;  %1909 = vmatmul.mubr.bf16.gmra.mrb[80].mxu1 %v1544_v39 }
 0x20f   : > { %v1430_v44 = vadd.f32 %v1429_v43, %v3409_v26  ;;  %v1431_v0 = vpop.f32.mrb[22].mxu1 }
 0x210   : > { %v1432_v45 = vadd.f32 %v1431_v0, %v3406_v25  ;;  %v1433_v46 = vpop.f32.mrb[23].mxu1  ;;  %v1508_v48 = vmax.f32 %v1428_v42, 0.0 }
 0x211   : > { %v1434_v47 = vadd.f32 %v1433_v46, %v3409_v26  ;;  %v1509_v50 = vmax.f32 %v1430_v44, 0.0 }
 0x212   : > { %v1510_v49 = vmax.f32 %v1432_v45, 0.0 }
 0x213   : > { %v1511_v51 = vmax.f32 %v1434_v47, 0.0 }
 0x214   : > { %v1546_v52 = vpack.c.bf16 %v1510_v49, %v1508_v48 }
 0x215   : > { %v1547_v53 = vpack.c.bf16 %v1511_v51, %v1509_v50 }
 0x217   : > { %1918 = vmatprep.mubr.bf16.mxu1 %v1547_v53 }
 0x218   : > { %1919 = vmatmul.mubr.bf16.gmra.mrb[84].mxu1 %v1546_v52 }
 0x21b   : > { %v1437_v55 = vpop.f32.mrb[24].mxu1 }
 0x21c   : > { %v1438_v56 = vadd.f32 %v1437_v55, %v3406_v25  ;;  %v1439_v58 = vpop.f32.mrb[25].mxu1 }
 0x21d   : > { %v1440_v59 = vadd.f32 %v1439_v58, %v3409_v26  ;;  %v1441_v60 = vpop.f32.mrb[26].mxu1 }
 0x21e   : > { %v1442_v61 = vadd.f32 %v1441_v60, %v3406_v25  ;;  %v1443_v62 = vpop.f32.mrb[27].mxu1  ;;  %v1512_v4 = vmax.f32 %v1438_v56, 0.0 }
 0x21f   : > { %v1444_v2 = vadd.f32 %v1443_v62, %v3409_v26  ;;  %v1513_v6 = vmax.f32 %v1440_v59, 0.0 }
 0x220   : > { %v1514_v5 = vmax.f32 %v1442_v61, 0.0 }
 0x221   : > { %v1515_v7 = vmax.f32 %v1444_v2, 0.0 }
 0x222   : > { %v1548_v8 = vpack.c.bf16 %v1514_v5, %v1512_v4 }
 0x223   : > { %v1549_v9 = vpack.c.bf16 %v1515_v7, %v1513_v6 }
 0x225   : > { %v1447_v14 = vpop.f32.mrb[28].mxu1  ;;  %1928 = vmatprep.mubr.bf16.mxu1 %v1549_v9 }
 0x226   : > { %v1448_v15 = vadd.f32 %v1447_v14, %v3406_v25  ;;  %v1449_v16 = vpop.f32.mrb[29].mxu1  ;;  %1929 = vmatmul.mubr.bf16.gmra.mrb[88].mxu1 %v1548_v8 }
 0x227   : > { %v1450_v17 = vadd.f32 %v1449_v16, %v3409_v26  ;;  %v1451_v18 = vpop.f32.mrb[30].mxu1 }
 0x228   : > { %v1452_v19 = vadd.f32 %v1451_v18, %v3406_v25  ;;  %v1453_v20 = vpop.f32.mrb[31].mxu1  ;;  %v1516_v12 = vmax.f32 %v1448_v15, 0.0  ;;  %v3530_v25 = vrot.slane %v1584_v22, %v3066_v63 }
 0x229   : > { %v1454_v21 = vadd.f32 %v1453_v20, %v3409_v26  ;;  %v1517_v13 = vmax.f32 %v1450_v17, 0.0 }
 0x22a   : > { %v1518_v23 = vmax.f32 %v1452_v19, 0.0 }
 0x22b   : > { %v1519_v24 = vmax.f32 %v1454_v21, 0.0 }
 0x22c   : > { %v1550_v10 = vpack.c.bf16 %v1518_v23, %v1516_v12 }
 0x22d   : > { %v1551_v11 = vpack.c.bf16 %v1519_v24, %v1517_v13 }
 0x22f   : > { %1938 = vmatprep.mubr.bf16.mxu1 %v1551_v11 }
 0x230   : > { %1939 = vmatmul.mubr.bf16.gmra.mrb[92].mxu1 %v1550_v10 }
 0x251   : > { %v1790_v54 = vpop.f32.mrb[32].mxu1 }
 0x252   : > { %v1791_v26 = vadd.f32 %v1790_v54, %v3527_v27  ;;  %v1792_v57 = vpop.f32.mrb[33].mxu1 }
 0x253   : > { %v1793_v28 = vadd.f32 %v1792_v57, %v3530_v25  ;;  %v1794_v29 = vpop.f32.mrb[34].mxu1 }
 0x254   : > { %v1795_v30 = vadd.f32 %v1794_v29, %v3527_v27  ;;  %v1796_v31 = vpop.f32.mrb[35].mxu1  ;;  %v1949_v33 = vmax.f32 %v1791_v26, 0.0 }
 0x255   : > { %v1797_v32 = vadd.f32 %v1796_v31, %v3530_v25  ;;  %v1950_v35 = vmax.f32 %v1793_v28, 0.0 }
 0x256   : > { %v1951_v34 = vmax.f32 %v1795_v30, 0.0 }
 0x257   : > { %v1952_v3 = vmax.f32 %v1797_v32, 0.0 }
 0x258   : > { %v2013_v36 = vpack.c.bf16 %v1951_v34, %v1949_v33 }
 0x259   : > { %v2014_v1 = vpack.c.bf16 %v1952_v3, %v1950_v35 }
 0x25b   : > { %v1800_v63 = vpop.f32.mrb[36].mxu1  ;;  %2212 = vmatprep.mubr.bf16.mxu0 %v2014_v1 }
 0x25c   : > { %v1801_v37 = vadd.f32 %v1800_v63, %v3527_v27  ;;  %v1802_v38 = vpop.f32.mrb[37].mxu1  ;;  %2213 = vmatmul.mubr.bf16.vlgmr.msra.gmra.mrb[32].mxu0 %v2013_v36 }
 0x25d   : > { %v1803_v39 = vadd.f32 %v1802_v38, %v3530_v25  ;;  %v1804_v40 = vpop.f32.mrb[38].mxu1 }
 0x25e   : > { %v1805_v41 = vadd.f32 %v1804_v40, %v3527_v27  ;;  %v1806_v42 = vpop.f32.mrb[39].mxu1  ;;  %v1953_v44 = vmax.f32 %v1801_v37, 0.0 }
 0x25f   : > { %v1807_v43 = vadd.f32 %v1806_v42, %v3530_v25  ;;  %v1954_v45 = vmax.f32 %v1803_v39, 0.0 }
 0x260   : > { %v1955_v0 = vmax.f32 %v1805_v41, 0.0 }
 0x261   : > { %v1956_v46 = vmax.f32 %v1807_v43, 0.0 }
 0x262   : > { %v2015_v47 = vpack.c.bf16 %v1955_v0, %v1953_v44 }
 0x263   : > { %v2016_v48 = vpack.c.bf16 %v1956_v46, %v1954_v45 }
 0x265   : > { %2220 = vmatprep.mubr.bf16.mxu0 %v2016_v48 }
 0x266   : > { %2221 = vmatmul.mubr.bf16.gmra.mrb[36].mxu0 %v2015_v47 }
 0x269   : > { %v1810_v49 = vpop.f32.mrb[40].mxu1 }
 0x26a   : > { %v1811_v50 = vadd.f32 %v1810_v49, %v3527_v27  ;;  %v1812_v51 = vpop.f32.mrb[41].mxu1 }
 0x26b   : > { %v1813_v52 = vadd.f32 %v1812_v51, %v3530_v25  ;;  %v1814_v53 = vpop.f32.mrb[42].mxu1 }
 0x26c   : > { %v1815_v55 = vadd.f32 %v1814_v53, %v3527_v27  ;;  %v1816_v56 = vpop.f32.mrb[43].mxu1  ;;  %v1957_v59 = vmax.f32 %v1811_v50, 0.0 }
 0x26d   : > { %v1817_v58 = vadd.f32 %v1816_v56, %v3530_v25  ;;  %v1958_v61 = vmax.f32 %v1813_v52, 0.0 }
 0x26e   : > { %v1959_v60 = vmax.f32 %v1815_v55, 0.0 }
 0x26f   : > { %v1960_v62 = vmax.f32 %v1817_v58, 0.0 }
 0x270   : > { %v2017_v2 = vpack.c.bf16 %v1959_v60, %v1957_v59 }
 0x271   : > { %v2018_v4 = vpack.c.bf16 %v1960_v62, %v1958_v61 }
 0x273   : > { %v1820_v5 = vpop.f32.mrb[44].mxu1  ;;  %2228 = vmatprep.mubr.bf16.mxu0 %v2018_v4 }
 0x274   : > { %v1821_v6 = vadd.f32 %v1820_v5, %v3527_v27  ;;  %v1822_v7 = vpop.f32.mrb[45].mxu1  ;;  %2229 = vmatmul.mubr.bf16.gmra.mrb[40].mxu0 %v2017_v2 }
 0x275   : > { %v1823_v8 = vadd.f32 %v1822_v7, %v3530_v25  ;;  %v1824_v9 = vpop.f32.mrb[46].mxu1 }
 0x276   : > { %v1825_v14 = vadd.f32 %v1824_v9, %v3527_v27  ;;  %v1826_v15 = vpop.f32.mrb[47].mxu1  ;;  %v1961_v17 = vmax.f32 %v1821_v6, 0.0 }
 0x277   : > { %v1827_v16 = vadd.f32 %v1826_v15, %v3530_v25  ;;  %v1962_v19 = vmax.f32 %v1823_v8, 0.0 }
 0x278   : > { %v1963_v18 = vmax.f32 %v1825_v14, 0.0 }
 0x279   : > { %v1964_v20 = vmax.f32 %v1827_v16, 0.0 }
 0x27a   : > { %v2019_v21 = vpack.c.bf16 %v1963_v18, %v1961_v17 }
 0x27b   : > { %v2020_v12 = vpack.c.bf16 %v1964_v20, %v1962_v19 }
 0x27d   : > { %2236 = vmatprep.mubr.bf16.mxu0 %v2020_v12 }
 0x27e   : > { %2237 = vmatmul.mubr.bf16.gmra.mrb[44].mxu0 %v2019_v21 }
 0x281   : > { %v1830_v23 = vpop.f32.mrb[48].mxu1 }
 0x282   : > { %v1831_v13 = vadd.f32 %v1830_v23, %v3527_v27  ;;  %v1832_v24 = vpop.f32.mrb[49].mxu1 }
 0x283   : > { %v1833_v10 = vadd.f32 %v1832_v24, %v3530_v25  ;;  %v1834_v11 = vpop.f32.mrb[50].mxu1 }
 0x284   : > { %v1835_v22 = vadd.f32 %v1834_v11, %v3527_v27  ;;  %v1836_v54 = vpop.f32.mrb[51].mxu1  ;;  %v1965_v57 = vmax.f32 %v1831_v13, 0.0 }
 0x285   : > { %v1837_v26 = vadd.f32 %v1836_v54, %v3530_v25  ;;  %v1966_v29 = vmax.f32 %v1833_v10, 0.0 }
 0x286   : > { %v1967_v28 = vmax.f32 %v1835_v22, 0.0 }
 0x287   : > { %v1968_v30 = vmax.f32 %v1837_v26, 0.0 }
 0x288   : > { %v2021_v31 = vpack.c.bf16 %v1967_v28, %v1965_v57 }
 0x289   : > { %v2022_v32 = vpack.c.bf16 %v1968_v30, %v1966_v29 }
 0x28b   : > { %v1840_v33 = vpop.f32.mrb[52].mxu1  ;;  %2244 = vmatprep.mubr.bf16.mxu0 %v2022_v32 }
 0x28c   : > { %v1841_v34 = vadd.f32 %v1840_v33, %v3527_v27  ;;  %v1842_v35 = vpop.f32.mrb[53].mxu1  ;;  %2245 = vmatmul.mubr.bf16.gmra.mrb[48].mxu0 %v2021_v31 }
 0x28d   : > { %v1843_v3 = vadd.f32 %v1842_v35, %v3530_v25  ;;  %v1844_v36 = vpop.f32.mrb[54].mxu1 }
 0x28e   : > { %v1845_v1 = vadd.f32 %v1844_v36, %v3527_v27  ;;  %v1846_v63 = vpop.f32.mrb[55].mxu1  ;;  %v1969_v38 = vmax.f32 %v1841_v34, 0.0 }
 0x28f   : > { %v1847_v37 = vadd.f32 %v1846_v63, %v3530_v25  ;;  %v1970_v40 = vmax.f32 %v1843_v3, 0.0 }
 0x290   : > { %v1971_v39 = vmax.f32 %v1845_v1, 0.0 }
 0x291   : > { %v1972_v41 = vmax.f32 %v1847_v37, 0.0 }
 0x292   : > { %v2023_v42 = vpack.c.bf16 %v1971_v39, %v1969_v38 }
 0x293   : > { %v2024_v43 = vpack.c.bf16 %v1972_v41, %v1970_v40 }
 0x295   : > { %2252 = vmatprep.mubr.bf16.mxu0 %v2024_v43 }
 0x296   : > { %2253 = vmatmul.mubr.bf16.gmra.mrb[52].mxu0 %v2023_v42 }
 0x299   : > { %v1850_v44 = vpop.f32.mrb[56].mxu1 }
 0x29a   : > { %v1851_v0 = vadd.f32 %v1850_v44, %v3527_v27  ;;  %v1852_v45 = vpop.f32.mrb[57].mxu1 }
 0x29b   : > { %v1853_v46 = vadd.f32 %v1852_v45, %v3530_v25  ;;  %v1854_v47 = vpop.f32.mrb[58].mxu1 }
 0x29c   : > { %v1855_v48 = vadd.f32 %v1854_v47, %v3527_v27  ;;  %v1856_v49 = vpop.f32.mrb[59].mxu1  ;;  %v1973_v51 = vmax.f32 %v1851_v0, 0.0 }
 0x29d   : > { %v1857_v50 = vadd.f32 %v1856_v49, %v3530_v25  ;;  %v1974_v53 = vmax.f32 %v1853_v46, 0.0 }
 0x29e   : > { %v1975_v52 = vmax.f32 %v1855_v48, 0.0 }
 0x29f   : > { %v1976_v55 = vmax.f32 %v1857_v50, 0.0 }
 0x2a0   : > { %v2025_v56 = vpack.c.bf16 %v1975_v52, %v1973_v51 }
 0x2a1   : > { %v2026_v58 = vpack.c.bf16 %v1976_v55, %v1974_v53 }
 0x2a3   : > { %v1860_v59 = vpop.f32.mrb[60].mxu1  ;;  %2260 = vmatprep.mubr.bf16.mxu0 %v2026_v58 }
 0x2a4   : > { %v1861_v60 = vadd.f32 %v1860_v59, %v3527_v27  ;;  %v1862_v61 = vpop.f32.mrb[61].mxu1  ;;  %2261 = vmatmul.mubr.bf16.gmra.mrb[56].mxu0 %v2025_v56 }
 0x2a5   : > { %v1863_v62 = vadd.f32 %v1862_v61, %v3530_v25  ;;  %v1864_v2 = vpop.f32.mrb[62].mxu1 }
 0x2a6   : > { %v1865_v4 = vadd.f32 %v1864_v2, %v3527_v27  ;;  %v1866_v5 = vpop.f32.mrb[63].mxu1  ;;  %v1977_v7 = vmax.f32 %v1861_v60, 0.0 }
 0x2a7   : > { %v1867_v6 = vadd.f32 %v1866_v5, %v3530_v25  ;;  %v1978_v9 = vmax.f32 %v1863_v62, 0.0 }
 0x2a8   : > { %v1979_v8 = vmax.f32 %v1865_v4, 0.0 }
 0x2a9   : > { %v1980_v14 = vmax.f32 %v1867_v6, 0.0 }
 0x2aa   : > { %v2027_v15 = vpack.c.bf16 %v1979_v8, %v1977_v7 }
 0x2ab   : > { %v2028_v16 = vpack.c.bf16 %v1980_v14, %v1978_v9 }
 0x2ad   : > { %2268 = vmatprep.mubr.bf16.mxu0 %v2028_v16 }
 0x2ae   : > { %2269 = vmatmul.mubr.bf16.gmra.mrb[60].mxu0 %v2027_v15 }
 0x2b1   : > { %v1870_v17 = vpop.f32.mrb[64].mxu1 }
 0x2b2   : > { %v1871_v18 = vadd.f32 %v1870_v17, %v3527_v27  ;;  %v1872_v19 = vpop.f32.mrb[65].mxu1 }
 0x2b3   : > { %v1873_v20 = vadd.f32 %v1872_v19, %v3530_v25  ;;  %v1874_v21 = vpop.f32.mrb[66].mxu1 }
 0x2b4   : > { %v1875_v12 = vadd.f32 %v1874_v21, %v3527_v27  ;;  %v1876_v23 = vpop.f32.mrb[67].mxu1  ;;  %v1981_v24 = vmax.f32 %v1871_v18, 0.0 }
 0x2b5   : > { %v1877_v13 = vadd.f32 %v1876_v23, %v3530_v25  ;;  %v1982_v11 = vmax.f32 %v1873_v20, 0.0 }
 0x2b6   : > { %v1983_v10 = vmax.f32 %v1875_v12, 0.0 }
 0x2b7   : > { %v1984_v22 = vmax.f32 %v1877_v13, 0.0 }
 0x2b8   : > { %v2029_v54 = vpack.c.bf16 %v1983_v10, %v1981_v24 }
 0x2b9   : > { %v2030_v26 = vpack.c.bf16 %v1984_v22, %v1982_v11 }
 0x2bb   : > { %v1880_v57 = vpop.f32.mrb[68].mxu1  ;;  %2276 = vmatprep.mubr.bf16.mxu0 %v2030_v26 }
 0x2bc   : > { %v1881_v28 = vadd.f32 %v1880_v57, %v3527_v27  ;;  %v1882_v29 = vpop.f32.mrb[69].mxu1  ;;  %2277 = vmatmul.mubr.bf16.gmra.mrb[64].mxu0 %v2029_v54 }
 0x2bd   : > { %v1883_v30 = vadd.f32 %v1882_v29, %v3530_v25  ;;  %v1884_v31 = vpop.f32.mrb[70].mxu1 }
 0x2be   : > { %v1885_v32 = vadd.f32 %v1884_v31, %v3527_v27  ;;  %v1886_v33 = vpop.f32.mrb[71].mxu1  ;;  %v1985_v35 = vmax.f32 %v1881_v28, 0.0 }
 0x2bf   : > { %v1887_v34 = vadd.f32 %v1886_v33, %v3530_v25  ;;  %v1986_v36 = vmax.f32 %v1883_v30, 0.0 }
 0x2c0   : > { %v1987_v3 = vmax.f32 %v1885_v32, 0.0 }
 0x2c1   : > { %v1988_v1 = vmax.f32 %v1887_v34, 0.0 }
 0x2c2   : > { %v2031_v63 = vpack.c.bf16 %v1987_v3, %v1985_v35 }
 0x2c3   : > { %v2032_v37 = vpack.c.bf16 %v1988_v1, %v1986_v36 }
 0x2c5   : > { %2284 = vmatprep.mubr.bf16.mxu0 %v2032_v37 }
 0x2c6   : > { %2285 = vmatmul.mubr.bf16.gmra.mrb[68].mxu0 %v2031_v63 }
 0x2c9   : > { %v1890_v38 = vpop.f32.mrb[72].mxu1 }
 0x2ca   : > { %v1891_v39 = vadd.f32 %v1890_v38, %v3527_v27  ;;  %v1892_v40 = vpop.f32.mrb[73].mxu1 }
 0x2cb   : > { %v1893_v41 = vadd.f32 %v1892_v40, %v3530_v25  ;;  %v1894_v42 = vpop.f32.mrb[74].mxu1 }
 0x2cc   : > { %v1895_v43 = vadd.f32 %v1894_v42, %v3527_v27  ;;  %v1896_v44 = vpop.f32.mrb[75].mxu1  ;;  %v1989_v45 = vmax.f32 %v1891_v39, 0.0 }
 0x2cd   : > { %v1897_v0 = vadd.f32 %v1896_v44, %v3530_v25  ;;  %v1990_v47 = vmax.f32 %v1893_v41, 0.0 }
 0x2ce   : > { %v1991_v46 = vmax.f32 %v1895_v43, 0.0 }
 0x2cf   : > { %v1992_v48 = vmax.f32 %v1897_v0, 0.0 }
 0x2d0   : > { %v2033_v49 = vpack.c.bf16 %v1991_v46, %v1989_v45 }
 0x2d1   : > { %v2034_v50 = vpack.c.bf16 %v1992_v48, %v1990_v47 }
 0x2d3   : > { %v1900_v51 = vpop.f32.mrb[76].mxu1  ;;  %2292 = vmatprep.mubr.bf16.mxu0 %v2034_v50 }
 0x2d4   : > { %v1901_v52 = vadd.f32 %v1900_v51, %v3527_v27  ;;  %v1902_v53 = vpop.f32.mrb[77].mxu1  ;;  %2293 = vmatmul.mubr.bf16.gmra.mrb[72].mxu0 %v2033_v49 }
 0x2d5   : > { %v1903_v55 = vadd.f32 %v1902_v53, %v3530_v25  ;;  %v1904_v56 = vpop.f32.mrb[78].mxu1 }
 0x2d6   : > { %v1905_v58 = vadd.f32 %v1904_v56, %v3527_v27  ;;  %v1906_v59 = vpop.f32.mrb[79].mxu1  ;;  %v1993_v61 = vmax.f32 %v1901_v52, 0.0 }
 0x2d7   : > { %v1907_v60 = vadd.f32 %v1906_v59, %v3530_v25  ;;  %v1994_v2 = vmax.f32 %v1903_v55, 0.0 }
 0x2d8   : > { %v1995_v62 = vmax.f32 %v1905_v58, 0.0 }
 0x2d9   : > { %v1996_v4 = vmax.f32 %v1907_v60, 0.0 }
 0x2da   : > { %v2035_v5 = vpack.c.bf16 %v1995_v62, %v1993_v61  ;;  %v3599_v62 = vld [vmem:[%s3715_s8] ss:$0 sm:$0xff] }
 0x2db   : > { %v2036_v6 = vpack.c.bf16 %v1996_v4, %v1994_v2 }
 0x2dd   : > { %2300 = vmatprep.mubr.bf16.mxu0 %v2036_v6 }
 0x2de   : > { %2301 = vmatmul.mubr.bf16.gmra.mrb[76].mxu0 %v2035_v5 }
 0x2e1   : > { %v1910_v7 = vpop.f32.mrb[80].mxu1 }
 0x2e2   : > { %v1911_v8 = vadd.f32 %v1910_v7, %v3527_v27  ;;  %v1912_v9 = vpop.f32.mrb[81].mxu1 }
 0x2e3   : > { %v1913_v14 = vadd.f32 %v1912_v9, %v3530_v25  ;;  %v1914_v15 = vpop.f32.mrb[82].mxu1 }
 0x2e4   : > { %v1915_v16 = vadd.f32 %v1914_v15, %v3527_v27  ;;  %v1916_v17 = vpop.f32.mrb[83].mxu1  ;;  %v1997_v19 = vmax.f32 %v1911_v8, 0.0 }
 0x2e5   : > { %v1917_v18 = vadd.f32 %v1916_v17, %v3530_v25  ;;  %v1998_v21 = vmax.f32 %v1913_v14, 0.0 }
 0x2e6   : > { %v1999_v20 = vmax.f32 %v1915_v16, 0.0 }
 0x2e7   : > { %v2000_v12 = vmax.f32 %v1917_v18, 0.0 }
 0x2e8   : > { %v2037_v23 = vpack.c.bf16 %v1999_v20, %v1997_v19 }
 0x2e9   : > { %v2038_v13 = vpack.c.bf16 %v2000_v12, %v1998_v21 }
 0x2eb   : > { %v1920_v24 = vpop.f32.mrb[84].mxu1  ;;  %2308 = vmatprep.mubr.bf16.mxu0 %v2038_v13 }
 0x2ec   : > { %v1921_v10 = vadd.f32 %v1920_v24, %v3527_v27  ;;  %v1922_v11 = vpop.f32.mrb[85].mxu1  ;;  %2309 = vmatmul.mubr.bf16.gmra.mrb[80].mxu0 %v2037_v23 }
 0x2ed   : > { %v1923_v22 = vadd.f32 %v1922_v11, %v3530_v25  ;;  %v1924_v54 = vpop.f32.mrb[86].mxu1 }
 0x2ee   : > { %v1925_v26 = vadd.f32 %v1924_v54, %v3527_v27  ;;  %v1926_v57 = vpop.f32.mrb[87].mxu1  ;;  %v2001_v29 = vmax.f32 %v1921_v10, 0.0 }
 0x2ef   : > { %v1927_v28 = vadd.f32 %v1926_v57, %v3530_v25  ;;  %v2002_v31 = vmax.f32 %v1923_v22, 0.0 }
 0x2f0   : > { %v2003_v30 = vmax.f32 %v1925_v26, 0.0 }
 0x2f1   : > { %v2004_v32 = vmax.f32 %v1927_v28, 0.0 }
 0x2f2   : > { %v2039_v33 = vpack.c.bf16 %v2003_v30, %v2001_v29 }
 0x2f3   : > { %v2040_v34 = vpack.c.bf16 %v2004_v32, %v2002_v31 }
 0x2f5   : > { %2316 = vmatprep.mubr.bf16.mxu0 %v2040_v34 }
 0x2f6   : > { %2317 = vmatmul.mubr.bf16.gmra.mrb[84].mxu0 %v2039_v33 }
 0x2f9   : > { %v1930_v35 = vpop.f32.mrb[88].mxu1 }
 0x2fa   : > { %v1931_v3 = vadd.f32 %v1930_v35, %v3527_v27  ;;  %v1932_v36 = vpop.f32.mrb[89].mxu1 }
 0x2fb   : > { %v1933_v1 = vadd.f32 %v1932_v36, %v3530_v25  ;;  %v1934_v63 = vpop.f32.mrb[90].mxu1 }
 0x2fc   : > { %v1935_v37 = vadd.f32 %v1934_v63, %v3527_v27  ;;  %v1936_v38 = vpop.f32.mrb[91].mxu1  ;;  %v2005_v40 = vmax.f32 %v1931_v3, 0.0 }
 0x2fd   : > { %v1937_v39 = vadd.f32 %v1936_v38, %v3530_v25  ;;  %v2006_v42 = vmax.f32 %v1933_v1, 0.0 }
 0x2fe   : > { %v2007_v41 = vmax.f32 %v1935_v37, 0.0 }
 0x2ff   : > { %v2008_v43 = vmax.f32 %v1937_v39, 0.0 }
 0x300   : > { %v2041_v44 = vpack.c.bf16 %v2007_v41, %v2005_v40 }
 0x301   : > { %v2042_v0 = vpack.c.bf16 %v2008_v43, %v2006_v42 }
 0x303   : > { %v1940_v45 = vpop.f32.mrb[92].mxu1  ;;  %2324 = vmatprep.mubr.bf16.mxu0 %v2042_v0 }
 0x304   : > { %v1941_v46 = vadd.f32 %v1940_v45, %v3527_v27  ;;  %v1942_v47 = vpop.f32.mrb[93].mxu1  ;;  %2325 = vmatmul.mubr.bf16.gmra.mrb[88].mxu0 %v2041_v44 }
 0x305   : > { %v1943_v48 = vadd.f32 %v1942_v47, %v3530_v25  ;;  %v1944_v49 = vpop.f32.mrb[94].mxu1 }
 0x306   : > { %v1945_v50 = vadd.f32 %v1944_v49, %v3527_v27  ;;  %v1946_v51 = vpop.f32.mrb[95].mxu1  ;;  %v2009_v53 = vmax.f32 %v1941_v46, 0.0 }
 0x307   : > { %v1947_v52 = vadd.f32 %v1946_v51, %v3530_v25  ;;  %v2010_v56 = vmax.f32 %v1943_v48, 0.0 }
 0x308   : > { %v2011_v55 = vmax.f32 %v1945_v50, 0.0 }
 0x309   : > { %v2012_v58 = vmax.f32 %v1947_v52, 0.0 }
 0x30a   : > { %v2043_v59 = vpack.c.bf16 %v2011_v55, %v2009_v53 }
 0x30b   : > { %v2044_v60 = vpack.c.bf16 %v2012_v58, %v2010_v56 }
 0x30d   : > { %2332 = vmatprep.mubr.bf16.mxu0 %v2044_v60 }
 0x30e   : > { %2333 = vmatmul.mubr.bf16.gmra.mrb[92].mxu0 %v2043_v59 }
 0x32f   : > { %v2538_v61 = vpop.f32.mrb[32].mxu0 }
 0x330   : > { %v2539_v2 = vpop.f32.mrb[33].mxu0 }
 0x331   : > { %v2540_v27 = vadd.f32 %v2539_v2, %v2538_v61  ;;  %v2541_v4 = vpop.f32.mrb[34].mxu0 }
 0x332   : > { %v2542_v25 = vpop.f32.mrb[35].mxu0 }
 0x333   : > { %v2215_v5 = vadd.f32 %v2540_v27, %v3599_v62  ;;  %v2543_v6 = vadd.f32 %v2542_v25, %v2541_v4 }
 0x335   : > { %2342 = vst.msk [vmem:[%s3606_s29] sm:$0xff] %vm2341_vm0, %v2215_v5  ;;  %v2218_v7 = vadd.f32 %v2543_v6, %v3599_v62 }
 0x337   : > { %2343 = vst.msk [vmem:[%s3606_s29 + $0x8] sm:$0xff] %vm2341_vm0, %v2218_v7 }
 0x339   : > { %v2544_v8 = vpop.f32.mrb[36].mxu0 }
 0x33a   : > { %v2545_v9 = vpop.f32.mrb[37].mxu0 }
 0x33b   : > { %v2546_v14 = vadd.f32 %v2545_v9, %v2544_v8  ;;  %v2547_v15 = vpop.f32.mrb[38].mxu0 }
 0x33c   : > { %v2548_v16 = vpop.f32.mrb[39].mxu0 }
 0x33d   : > { %v2223_v17 = vadd.f32 %v2546_v14, %v3599_v62  ;;  %v2549_v18 = vadd.f32 %v2548_v16, %v2547_v15 }
 0x33f   : > { %2344 = vst.msk [vmem:[%s3606_s29 + $0x10] sm:$0xff] %vm2341_vm0, %v2223_v17  ;;  %v2226_v19 = vadd.f32 %v2549_v18, %v3599_v62 }
 0x341   : > { %2345 = vst.msk [vmem:[%s3606_s29 + $0x18] sm:$0xff] %vm2341_vm0, %v2226_v19 }
 0x347   : > { %v2550_v20 = vpop.f32.mrb[40].mxu0 }
 0x348   : > { %v2551_v21 = vpop.f32.mrb[41].mxu0 }
 0x349   : > { %v2552_v12 = vadd.f32 %v2551_v21, %v2550_v20  ;;  %v2553_v23 = vpop.f32.mrb[42].mxu0 }
 0x34a   : > { %v2554_v13 = vpop.f32.mrb[43].mxu0 }
 0x34b   : > { %v2231_v24 = vadd.f32 %v2552_v12, %v3599_v62  ;;  %v2555_v10 = vadd.f32 %v2554_v13, %v2553_v23 }
 0x34d   : > { %2346 = vst.msk [vmem:[%s3606_s29 + $0x20] sm:$0xff] %vm2341_vm0, %v2231_v24  ;;  %v2234_v11 = vadd.f32 %v2555_v10, %v3599_v62 }
 0x34f   : > { %2347 = vst.msk [vmem:[%s3606_s29 + $0x28] sm:$0xff] %vm2341_vm0, %v2234_v11 }
 0x351   : > { %v2556_v22 = vpop.f32.mrb[44].mxu0 }
 0x352   : > { %v2557_v54 = vpop.f32.mrb[45].mxu0 }
 0x353   : > { %v2558_v26 = vadd.f32 %v2557_v54, %v2556_v22  ;;  %v2559_v57 = vpop.f32.mrb[46].mxu0 }
 0x354   : > { %v2560_v28 = vpop.f32.mrb[47].mxu0 }
 0x355   : > { %v2239_v29 = vadd.f32 %v2558_v26, %v3599_v62  ;;  %v2561_v30 = vadd.f32 %v2560_v28, %v2559_v57 }
 0x357   : > { %2348 = vst.msk [vmem:[%s3606_s29 + $0x30] sm:$0xff] %vm2341_vm0, %v2239_v29  ;;  %v2242_v31 = vadd.f32 %v2561_v30, %v3599_v62 }
 0x359   : > { %2349 = vst.msk [vmem:[%s3606_s29 + $0x38] sm:$0xff] %vm2341_vm0, %v2242_v31 }
 0x35f   : > { %v2562_v32 = vpop.f32.mrb[48].mxu0 }
 0x360   : > { %v2563_v33 = vpop.f32.mrb[49].mxu0 }
 0x361   : > { %v2564_v34 = vadd.f32 %v2563_v33, %v2562_v32  ;;  %v2565_v35 = vpop.f32.mrb[50].mxu0 }
 0x362   : > { %v2566_v3 = vpop.f32.mrb[51].mxu0 }
 0x363   : > { %v2247_v36 = vadd.f32 %v2564_v34, %v3599_v62  ;;  %v2567_v1 = vadd.f32 %v2566_v3, %v2565_v35 }
 0x365   : > { %2350 = vst.msk [vmem:[%s3606_s29 + $0x40] sm:$0xff] %vm2341_vm0, %v2247_v36  ;;  %v2250_v63 = vadd.f32 %v2567_v1, %v3599_v62 }
 0x367   : > { %2351 = vst.msk [vmem:[%s3606_s29 + $0x48] sm:$0xff] %vm2341_vm0, %v2250_v63 }
 0x369   : > { %v2568_v37 = vpop.f32.mrb[52].mxu0 }
 0x36a   : > { %v2569_v38 = vpop.f32.mrb[53].mxu0 }
 0x36b   : > { %v2570_v39 = vadd.f32 %v2569_v38, %v2568_v37  ;;  %v2571_v40 = vpop.f32.mrb[54].mxu0 }
 0x36c   : > { %v2572_v41 = vpop.f32.mrb[55].mxu0 }
 0x36d   : > { %v2255_v42 = vadd.f32 %v2570_v39, %v3599_v62  ;;  %v2573_v43 = vadd.f32 %v2572_v41, %v2571_v40 }
 0x36f   : > { %2352 = vst.msk [vmem:[%s3606_s29 + $0x50] sm:$0xff] %vm2341_vm0, %v2255_v42  ;;  %v2258_v44 = vadd.f32 %v2573_v43, %v3599_v62 }
 0x371   : > { %2353 = vst.msk [vmem:[%s3606_s29 + $0x58] sm:$0xff] %vm2341_vm0, %v2258_v44 }
 0x377   : > { %v2574_v0 = vpop.f32.mrb[56].mxu0 }
 0x378   : > { %v2575_v45 = vpop.f32.mrb[57].mxu0 }
 0x379   : > { %v2576_v46 = vadd.f32 %v2575_v45, %v2574_v0  ;;  %v2577_v47 = vpop.f32.mrb[58].mxu0 }
 0x37a   : > { %v2578_v48 = vpop.f32.mrb[59].mxu0 }
 0x37b   : > { %v2263_v49 = vadd.f32 %v2576_v46, %v3599_v62  ;;  %v2579_v50 = vadd.f32 %v2578_v48, %v2577_v47 }
 0x37d   : > { %2354 = vst.msk [vmem:[%s3606_s29 + $0x60] sm:$0xff] %vm2341_vm0, %v2263_v49  ;;  %v2266_v51 = vadd.f32 %v2579_v50, %v3599_v62 }
 0x37f   : > { %2355 = vst.msk [vmem:[%s3606_s29 + $0x68] sm:$0xff] %vm2341_vm0, %v2266_v51 }
 0x381   : > { %v2580_v52 = vpop.f32.mrb[60].mxu0 }
 0x382   : > { %v2581_v53 = vpop.f32.mrb[61].mxu0 }
 0x383   : > { %v2582_v55 = vadd.f32 %v2581_v53, %v2580_v52  ;;  %v2583_v56 = vpop.f32.mrb[62].mxu0 }
 0x384   : > { %v2584_v58 = vpop.f32.mrb[63].mxu0 }
 0x385   : > { %v2271_v59 = vadd.f32 %v2582_v55, %v3599_v62  ;;  %v2585_v60 = vadd.f32 %v2584_v58, %v2583_v56 }
 0x387   : > { %2356 = vst.msk [vmem:[%s3606_s29 + $0x70] sm:$0xff] %vm2341_vm0, %v2271_v59  ;;  %v2274_v61 = vadd.f32 %v2585_v60, %v3599_v62 }
 0x389   : > { %2357 = vst.msk [vmem:[%s3606_s29 + $0x78] sm:$0xff] %vm2341_vm0, %v2274_v61 }
 0x38f   : > { %v2586_v2 = vpop.f32.mrb[64].mxu0 }
 0x390   : > { %v2587_v27 = vpop.f32.mrb[65].mxu0 }
 0x391   : > { %v2588_v4 = vadd.f32 %v2587_v27, %v2586_v2  ;;  %v2589_v25 = vpop.f32.mrb[66].mxu0 }
 0x392   : > { %v2590_v5 = vpop.f32.mrb[67].mxu0 }
 0x393   : > { %v2279_v6 = vadd.f32 %v2588_v4, %v3599_v62  ;;  %v2591_v7 = vadd.f32 %v2590_v5, %v2589_v25 }
 0x395   : > { %2358 = vst.msk [vmem:[%s3606_s29 + $0x80] sm:$0xff] %vm2341_vm0, %v2279_v6  ;;  %v2282_v8 = vadd.f32 %v2591_v7, %v3599_v62 }
 0x397   : > { %2359 = vst.msk [vmem:[%s3606_s29 + $0x88] sm:$0xff] %vm2341_vm0, %v2282_v8 }
 0x399   : > { %v2592_v9 = vpop.f32.mrb[68].mxu0 }
 0x39a   : > { %v2593_v14 = vpop.f32.mrb[69].mxu0 }
 0x39b   : > { %v2594_v15 = vadd.f32 %v2593_v14, %v2592_v9  ;;  %v2595_v16 = vpop.f32.mrb[70].mxu0 }
 0x39c   : > { %v2596_v17 = vpop.f32.mrb[71].mxu0 }
 0x39d   : > { %v2287_v18 = vadd.f32 %v2594_v15, %v3599_v62  ;;  %v2597_v19 = vadd.f32 %v2596_v17, %v2595_v16 }
 0x39f   : > { %2360 = vst.msk [vmem:[%s3606_s29 + $0x90] sm:$0xff] %vm2341_vm0, %v2287_v18  ;;  %v2290_v20 = vadd.f32 %v2597_v19, %v3599_v62 }
 0x3a1   : > { %2361 = vst.msk [vmem:[%s3606_s29 + $0x98] sm:$0xff] %vm2341_vm0, %v2290_v20 }
 0x3a7   : > { %v2598_v21 = vpop.f32.mrb[72].mxu0 }
 0x3a8   : > { %v2599_v12 = vpop.f32.mrb[73].mxu0 }
 0x3a9   : > { %v2600_v23 = vadd.f32 %v2599_v12, %v2598_v21  ;;  %v2601_v13 = vpop.f32.mrb[74].mxu0 }
 0x3aa   : > { %v2602_v24 = vpop.f32.mrb[75].mxu0 }
 0x3ab   : > { %v2295_v10 = vadd.f32 %v2600_v23, %v3599_v62  ;;  %v2603_v11 = vadd.f32 %v2602_v24, %v2601_v13 }
 0x3ad   : > { %2362 = vst.msk [vmem:[%s3606_s29 + $0xa0] sm:$0xff] %vm2341_vm0, %v2295_v10  ;;  %v2298_v22 = vadd.f32 %v2603_v11, %v3599_v62 }
 0x3af   : > { %2363 = vst.msk [vmem:[%s3606_s29 + $0xa8] sm:$0xff] %vm2341_vm0, %v2298_v22 }
 0x3b1   : > { %v2604_v54 = vpop.f32.mrb[76].mxu0 }
 0x3b2   : > { %v2605_v26 = vpop.f32.mrb[77].mxu0 }
 0x3b3   : > { %v2606_v57 = vadd.f32 %v2605_v26, %v2604_v54  ;;  %v2607_v28 = vpop.f32.mrb[78].mxu0 }
 0x3b4   : > { %v2608_v29 = vpop.f32.mrb[79].mxu0 }
 0x3b5   : > { %v2303_v30 = vadd.f32 %v2606_v57, %v3599_v62  ;;  %v2609_v31 = vadd.f32 %v2608_v29, %v2607_v28 }
 0x3b7   : > { %2364 = vst.msk [vmem:[%s3606_s29 + $0xb0] sm:$0xff] %vm2341_vm0, %v2303_v30  ;;  %v2306_v32 = vadd.f32 %v2609_v31, %v3599_v62 }
 0x3b9   : > { %2365 = vst.msk [vmem:[%s3606_s29 + $0xb8] sm:$0xff] %vm2341_vm0, %v2306_v32 }
 0x3bf   : > { %v2610_v33 = vpop.f32.mrb[80].mxu0 }
 0x3c0   : > { %v2611_v34 = vpop.f32.mrb[81].mxu0 }
 0x3c1   : > { %v2612_v35 = vadd.f32 %v2611_v34, %v2610_v33  ;;  %v2613_v3 = vpop.f32.mrb[82].mxu0 }
 0x3c2   : > { %v2614_v36 = vpop.f32.mrb[83].mxu0 }
 0x3c3   : > { %v2311_v1 = vadd.f32 %v2612_v35, %v3599_v62  ;;  %v2615_v63 = vadd.f32 %v2614_v36, %v2613_v3 }
 0x3c5   : > { %2366 = vst.msk [vmem:[%s3606_s29 + $0xc0] sm:$0xff] %vm2341_vm0, %v2311_v1  ;;  %v2314_v37 = vadd.f32 %v2615_v63, %v3599_v62 }
 0x3c7   : > { %2367 = vst.msk [vmem:[%s3606_s29 + $0xc8] sm:$0xff] %vm2341_vm0, %v2314_v37 }
 0x3c9   : > { %v2616_v38 = vpop.f32.mrb[84].mxu0 }
 0x3ca   : > { %v2617_v39 = vpop.f32.mrb[85].mxu0 }
 0x3cb   : > { %v2618_v40 = vadd.f32 %v2617_v39, %v2616_v38  ;;  %v2619_v41 = vpop.f32.mrb[86].mxu0 }
 0x3cc   : > { %v2620_v42 = vpop.f32.mrb[87].mxu0 }
 0x3cd   : > { %v2319_v43 = vadd.f32 %v2618_v40, %v3599_v62  ;;  %v2621_v44 = vadd.f32 %v2620_v42, %v2619_v41 }
 0x3cf   : > { %2368 = vst.msk [vmem:[%s3606_s29 + $0xd0] sm:$0xff] %vm2341_vm0, %v2319_v43  ;;  %v2322_v0 = vadd.f32 %v2621_v44, %v3599_v62 }
 0x3d1   : > { %2369 = vst.msk [vmem:[%s3606_s29 + $0xd8] sm:$0xff] %vm2341_vm0, %v2322_v0 }
 0x3d7   : > { %v2622_v45 = vpop.f32.mrb[88].mxu0 }
 0x3d8   : > { %v2623_v46 = vpop.f32.mrb[89].mxu0 }
 0x3d9   : > { %v2624_v47 = vadd.f32 %v2623_v46, %v2622_v45  ;;  %v2625_v48 = vpop.f32.mrb[90].mxu0 }
 0x3da   : > { %v2626_v49 = vpop.f32.mrb[91].mxu0 }
 0x3db   : > { %v2327_v50 = vadd.f32 %v2624_v47, %v3599_v62  ;;  %v2627_v51 = vadd.f32 %v2626_v49, %v2625_v48 }
 0x3dd   : > { %2370 = vst.msk [vmem:[%s3606_s29 + $0xe0] sm:$0xff] %vm2341_vm0, %v2327_v50  ;;  %v2330_v52 = vadd.f32 %v2627_v51, %v3599_v62 }
 0x3df   : > { %2371 = vst.msk [vmem:[%s3606_s29 + $0xe8] sm:$0xff] %vm2341_vm0, %v2330_v52 }
 0x3e1   : > { %v2628_v53 = vpop.f32.mrb[92].mxu0 }
 0x3e2   : > { %v2629_v55 = vpop.f32.mrb[93].mxu0 }
 0x3e3   : > { %v2630_v56 = vadd.f32 %v2629_v55, %v2628_v53  ;;  %v2631_v58 = vpop.f32.mrb[94].mxu0 }
 0x3e4   : > { %v2632_v59 = vpop.f32.mrb[95].mxu0 }
 0x3e5   : > { %v2335_v60 = vadd.f32 %v2630_v56, %v3599_v62  ;;  %v2633_v61 = vadd.f32 %v2632_v59, %v2631_v58 }
 0x3e7   : > { %2372 = vst.msk [vmem:[%s3606_s29 + $0xf0] sm:$0xff] %vm2341_vm0, %v2335_v60  ;;  %v2338_v2 = vadd.f32 %v2633_v61, %v3599_v62 }
 0x3e9   : > { %2373 = vst.msk [vmem:[%s3606_s29 + $0xf8] sm:$0xff] %vm2341_vm0, %v2338_v2 }
 0x3ea PF: > { %s19_s30 = sadd.s32 1, %s2835_s30  }
 0x3eb   : > { %p16_p4 = scmp.ge.s32.totalorder %s19_s30, 4  }
 0x3ed   :  { %18 = sbr.rel (!%p16_p4) target bundleno = 1 (0x1), region = 86 }

</bundles_post_ra>
